<compile_context>
chip_gen: v7x
topology: tpu7x:2x2x1
jax: 0.10.0
libtpu: 0.0.40
codegen_flags: <defaults>
</compile_context>

<pallas_src>
import numpy as np
import jax
import jax.numpy as jnp
from jax.experimental import pallas as pl
from jax.experimental.pallas import tpu as pltpu

# ---------------------------------------------------------------------------
# Problem geometry
# ---------------------------------------------------------------------------
CIN, C1 = 380, 230          # module channel sizes
CIN_P, C_P = 384, 256       # zero-padded to lane-friendly sizes
H = W = 4                   # spatial size for which the broadcast is valid
H2 = 2 * H - 2              # 6 : spatial size of v2
H3 = H2 - 2                 # 4 : spatial size of v3 (== H)
NPIX1 = H * W               # 16
NPIX2 = H2 * H2             # 36
NPIX3 = H3 * H3             # 16
NTAPS = 9                   # 3x3 taps


# ---------------------------------------------------------------------------
# Fused Pallas kernel
# ---------------------------------------------------------------------------
def _fused_kernel(x_ref, w1_ref, w2_ref, b2_ref, scat_ref, t_ref, w3_ref,
                  b3_ref, o_ref):
    """Whole forward pass in one kernel.

    x_ref    : (16, 384)   bf16  input pixels x padded channels
    w1_ref   : (384, 256)  bf16  1x1 transposed-conv weight (padded)
    w2_ref   : (256, 2304) bf16  per-tap flipped conv2 weights, concat on N
    b2_ref   : (1, 256)    f32   conv2 bias (padded)
    scat_ref : (36, 144)   bf16  merged 0/1 scatter (v1 pixel/tap -> v2 pixel)
    t_ref    : (144, 36)   bf16  stacked 0/1 gather (v2 pixel -> conv3 rows)
    w3_ref   : (9, 256)    bf16  conv3 flipped channel weights, one row per tap
    b3_ref   : (1,)        f32   conv3 bias (SMEM)
    o_ref    : (16, 256)   f32   v1 * sigmoid(v3)
    """
    # conv_transpose_26: 1x1 / stride 1 / no bias == per-pixel channel matmul
    # (bf16 MXU inputs, f32 accumulation).
    v1 = jnp.dot(x_ref[...], w1_ref[...],
                 preferred_element_type=jnp.float32)                 # (16, 256)

    # conv_transpose_28 (k=3, s=2, p=2, op=1), sub-pixel formulation:
    #   H_t = v1 @ W_t for all 9 taps in one matmul (only real pixels on MXU),
    #   v2  = Scat @ stack_t(H_t) + b2   (one K=144 matmul).
    h = jnp.dot(v1.astype(jnp.bfloat16), w2_ref[...],
                preferred_element_type=jnp.float32)                  # (16, 2304)
    hb = h.astype(jnp.bfloat16)
    # Restack the nine 256-wide lane slabs tap-major: row t*16 + p.
    hstk = jnp.concatenate(
        [hb[:, t * C_P:(t + 1) * C_P] for t in range(NTAPS)], axis=0)  # (144,256)
    v2 = jnp.dot(scat_ref[...], hstk,
                 preferred_element_type=jnp.float32) + b2_ref[...]   # (36, 256)

    # conv_transpose_29 (== valid 3x3 conv, Cout=1) + sigmoid + gate of v1.
    # Gather all 9 patches for all 16 outputs with one matmul (tap-major rows),
    # weight channels on the VPU (per-tap broadcast of w3 rows), reduce across
    # lanes on the XLU, exact sigmoid on the EUP.
    gall = jnp.dot(t_ref[...], v2.astype(jnp.bfloat16),
                   preferred_element_type=jnp.float32)               # (144, 256)
    w3 = w3_ref[...].astype(jnp.float32)                             # (9, 256)
    acc3 = gall[0:NPIX3, :] * w3[0:1, :]
    for t in range(1, NTAPS):
        acc3 = acc3 + gall[t * NPIX3:(t + 1) * NPIX3, :] * w3[t:t + 1, :]
    v3 = jnp.sum(acc3, axis=1, keepdims=True) + b3_ref[0]            # (16, 1)
    gate = 1.0 / (1.0 + jnp.exp(-v3))                                # exact sigmoid
    o_ref[...] = v1 * gate                                           # (16, 256)


_VMEM = pl.BlockSpec(memory_space=pltpu.MemorySpace.VMEM)
_SMEM = pl.BlockSpec(memory_space=pltpu.MemorySpace.SMEM)


def fused_forward_2d(x2d, params):
    w1p, w2cat, b2p, scat, tstack, w3flip, b3s = params
    return pl.pallas_call(
        _fused_kernel,
        out_shape=jax.ShapeDtypeStruct((NPIX1, C_P), jnp.float32),
        in_specs=[_VMEM, _VMEM, _VMEM, _VMEM, _VMEM, _VMEM, _VMEM, _SMEM],
        out_specs=_VMEM,
    )(x2d, w1p, w2cat, b2p, scat, tstack, w3flip, b3s)


# ---------------------------------------------------------------------------
# One-time host-side weight preprocessing (kept out of the jitted path)
# ---------------------------------------------------------------------------
def prepare_params(w1, w2, b2, w3, b3):
    w1 = np.asarray(w1, np.float32)
    w2 = np.asarray(w2, np.float32)
    b2 = np.asarray(b2, np.float32)
    w3 = np.asarray(w3, np.float32)
    b3 = np.asarray(b3, np.float32)

    # conv_transpose_26: (Cin, Cout, 1, 1) -> padded (384, 256) matrix.
    w1p = np.zeros((CIN_P, C_P), np.float32)
    w1p[:CIN, :C1] = w1[:, :, 0, 0]

    # conv_transpose_28: transposed conv == valid conv with spatially flipped
    # kernel over the (conceptually) dilated input.  W_t in (ci, co) layout,
    # concatenated tap-major along the output columns.
    w2cat = np.zeros((C_P, NTAPS * C_P), np.float32)
    for kh in range(3):
        for kw in range(3):
            t = kh * 3 + kw
            w2cat[:C1, t * C_P:t * C_P + C1] = w2[:, :, 2 - kh, 2 - kw]

    b2p = np.zeros((1, C_P), np.float32)
    b2p[0, :C1] = b2

    # 0/1 scatter matrices S_t (36, 16): v2 pixel (oh, ow) receives v1 pixel
    # ((oh+kh)/2, (ow+kw)/2) at tap (kh, kw) iff both indices are even; all
    # other taps hit zero-stuffed / output-padding positions and are skipped.
    smats = np.zeros((NTAPS, NPIX2, NPIX1), np.float32)
    for kh in range(3):
        for kw in range(3):
            t = kh * 3 + kw
            for oh in range(H2):
                for ow in range(H2):
                    dh, dw = oh + kh, ow + kw
                    if dh % 2 == 0 and dw % 2 == 0:
                        smats[t, oh * H2 + ow, (dh // 2) * W + (dw // 2)] = 1.0
    # Merge the 9 scatter matrices into one (36, 144): column index t*16 + p,
    # matching the tap-major restacking of h inside the kernel.
    scat = smats.transpose(1, 0, 2).reshape(NPIX2, NTAPS * NPIX1)

    # 0/1 gather matrix for conv3 (stacked tap-major): row t*16 + r selects the
    # v2 pixel feeding output pixel r at tap t.
    tstack = np.zeros((NTAPS * NPIX3, NPIX2), np.float32)
    for kh in range(3):
        for kw in range(3):
            t = kh * 3 + kw
            for oh in range(H3):
                for ow in range(H3):
                    tstack[t * NPIX3 + oh * H3 + ow,
                           (oh + kh) * H2 + (ow + kw)] = 1.0

    # conv_transpose_29 flipped channel weights, one padded row per tap
    # (broadcast per tap inside the kernel; not repeated).
    w3flip = np.zeros((NTAPS, C_P), np.float32)
    for kh in range(3):
        for kw in range(3):
            w3flip[kh * 3 + kw, :C1] = w3[:, 0, 2 - kh, 2 - kw]

    b3s = np.asarray(b3, np.float32).reshape(1)

    return (jnp.asarray(w1p, dtype=jnp.bfloat16),
            jnp.asarray(w2cat, dtype=jnp.bfloat16),
            jnp.asarray(b2p),
            jnp.asarray(scat, dtype=jnp.bfloat16),
            jnp.asarray(tstack, dtype=jnp.bfloat16),
            jnp.asarray(w3flip, dtype=jnp.bfloat16),
            jnp.asarray(b3s))


# ---------------------------------------------------------------------------
# Jitted forward (only layout in/out + the single pallas_call)
# ---------------------------------------------------------------------------
@jax.jit
def model_forward(x, params):
    n, cin, hx, wx = x.shape
    assert n == 1 and cin == CIN and hx == H and wx == W, (
        "v1 * sigmoid(v3) only broadcasts for 4x4 spatial inputs")
    x2d = jnp.transpose(x[0], (1, 2, 0)).reshape(hx * wx, cin)       # (16, 380)
    x2d = jnp.pad(x2d, ((0, 0), (0, CIN_P - cin))).astype(jnp.bfloat16)
    out2d = fused_forward_2d(x2d, params)                            # (16, 256)
    out = out2d[:, :C1].reshape(hx, wx, C1)                          # (4, 4, 230)
    return jnp.transpose(out, (2, 0, 1))[None]                       # (1,230,4,4)


# ---------------------------------------------------------------------------
# Pure-numpy reference (direct ConvTranspose2d definition) for validation
# ---------------------------------------------------------------------------
def _convt2d_np(x, w, b, stride, padding, output_padding):
    Cin, Hh, Ww = x.shape
    _, Cout, K, _ = w.shape
    Ho = (Hh - 1) * stride - 2 * padding + K + output_padding
    Wo = (Ww - 1) * stride - 2 * padding + K + output_padding
    y = np.zeros((Cout, Ho, Wo), np.float64)
    for ih in range(Hh):
        for iw in range(Ww):
            contrib = np.einsum('i,iokl->okl', x[:, ih, iw], w)
            for kh in range(K):
                oh = ih * stride - padding + kh
                if not (0 <= oh < Ho):
                    continue
                for kw in range(K):
                    ow = iw * stride - padding + kw
                    if not (0 <= ow < Wo):
                        continue
                    y[:, oh, ow] += contrib[:, kh, kw]
    if b is not None:
        y = y + b[:, None, None]
    return y


def reference_forward(x, w1, w2, b2, w3, b3):
    x0 = x[0].astype(np.float64)
    v1 = _convt2d_np(x0, w1.astype(np.float64), None, 1, 0, 0)
    v2 = _convt2d_np(v1, w2.astype(np.float64), b2.astype(np.float64), 2, 2, 1)
    v3 = _convt2d_np(v2, w3.astype(np.float64), b3.astype(np.float64), 1, 2, 0)
    v4 = 1.0 / (1.0 + np.exp(-v3))
    return (v1 * v4)[None]


# ---------------------------------------------------------------------------

if __name__ == "__main__":
    key = jax.random.PRNGKey(0)
    ks = jax.random.split(key, 6)

    # ConvTranspose2d weight layout: (Cin, Cout, kH, kW)
    w1 = jax.random.normal(ks[0], (CIN, C1, 1, 1), jnp.float32) / np.sqrt(CIN)
    w2 = jax.random.normal(ks[1], (C1, C1, 3, 3), jnp.float32) / np.sqrt(C1 * 9)
    b2 = 0.1 * jax.random.normal(ks[2], (C1,), jnp.float32)
    w3 = jax.random.normal(ks[3], (C1, 1, 3, 3), jnp.float32) / np.sqrt(C1 * 9)
    b3 = 0.1 * jax.random.normal(ks[4], (1,), jnp.float32)
    x1 = jax.random.normal(ks[5], (1, CIN, H, W), jnp.float32)

    params = prepare_params(w1, w2, b2, w3, b3)      # one-time weight prep
    out = jax.block_until_ready(model_forward(x1, params))

    ref = reference_forward(np.asarray(x1), np.asarray(w1), np.asarray(w2),
                            np.asarray(b2), np.asarray(w3), np.asarray(b3))
    np.testing.assert_allclose(np.asarray(out), ref, rtol=5e-2, atol=5e-2)

    print("KERNEL_OK")
</pallas_src>

<mosaic_0001>
module attributes {stable_mosaic.version = 11 : i64} {
  func.func @_fused_kernel(%arg0: memref<16x384xbf16, #tpu.memory_space<vmem>>, %arg1: memref<384x256xbf16, #tpu.memory_space<vmem>>, %arg2: memref<256x2304xbf16, #tpu.memory_space<vmem>>, %arg3: memref<1x256xf32, #tpu.memory_space<vmem>>, %arg4: memref<36x144xbf16, #tpu.memory_space<vmem>>, %arg5: memref<144x36xbf16, #tpu.memory_space<vmem>>, %arg6: memref<9x256xbf16, #tpu.memory_space<vmem>>, %arg7: memref<1xf32, #tpu.memory_space<smem>>, %arg8: memref<16x256xf32, #tpu.memory_space<vmem>>) attributes {dimension_semantics = [], scalar_prefetch = 0 : i64, scratch_operands = 0 : i64, tpu.core_type = #tpu.core_type<tc>} {
    %c0 = arith.constant 0 : index
    %c0_0 = arith.constant 0 : index
    %0 = vector.load %arg0[%c0, %c0_0] : memref<16x384xbf16, #tpu.memory_space<vmem>>, vector<16x384xbf16>
    %c0_1 = arith.constant 0 : index
    %c0_2 = arith.constant 0 : index
    %1 = vector.load %arg1[%c0_1, %c0_2] : memref<384x256xbf16, #tpu.memory_space<vmem>>, vector<384x256xbf16>
    %cst = arith.constant dense<0.000000e+00> : vector<16x256xf32>
    %2 = tpu.matmul %0, %1, %cst {dimension_numbers = #tpu.dot_dimension_numbers<[1], [0], [0], [1], [0, 0, 1, 1], [], []>} : vector<16x384xbf16>, vector<384x256xbf16>, vector<16x256xf32> -> vector<16x256xf32>
    %3 = arith.truncf %2 : vector<16x256xf32> to vector<16x256xbf16>
    %c0_3 = arith.constant 0 : index
    %c0_4 = arith.constant 0 : index
    %4 = vector.load %arg2[%c0_3, %c0_4] : memref<256x2304xbf16, #tpu.memory_space<vmem>>, vector<256x2304xbf16>
    %cst_5 = arith.constant dense<0.000000e+00> : vector<16x2304xf32>
    %5 = tpu.matmul %3, %4, %cst_5 {dimension_numbers = #tpu.dot_dimension_numbers<[1], [0], [0], [1], [0, 0, 1, 1], [], []>} : vector<16x256xbf16>, vector<256x2304xbf16>, vector<16x2304xf32> -> vector<16x2304xf32>
    %6 = arith.truncf %5 : vector<16x2304xf32> to vector<16x2304xbf16>
    %7 = vector.extract_strided_slice %6 {offsets = [0, 0], sizes = [16, 256], strides = [1, 1]} : vector<16x2304xbf16> to vector<16x256xbf16>
    %8 = vector.extract_strided_slice %6 {offsets = [0, 256], sizes = [16, 256], strides = [1, 1]} : vector<16x2304xbf16> to vector<16x256xbf16>
    %9 = vector.extract_strided_slice %6 {offsets = [0, 512], sizes = [16, 256], strides = [1, 1]} : vector<16x2304xbf16> to vector<16x256xbf16>
    %10 = vector.extract_strided_slice %6 {offsets = [0, 768], sizes = [16, 256], strides = [1, 1]} : vector<16x2304xbf16> to vector<16x256xbf16>
    %11 = vector.extract_strided_slice %6 {offsets = [0, 1024], sizes = [16, 256], strides = [1, 1]} : vector<16x2304xbf16> to vector<16x256xbf16>
    %12 = vector.extract_strided_slice %6 {offsets = [0, 1280], sizes = [16, 256], strides = [1, 1]} : vector<16x2304xbf16> to vector<16x256xbf16>
    %13 = vector.extract_strided_slice %6 {offsets = [0, 1536], sizes = [16, 256], strides = [1, 1]} : vector<16x2304xbf16> to vector<16x256xbf16>
    %14 = vector.extract_strided_slice %6 {offsets = [0, 1792], sizes = [16, 256], strides = [1, 1]} : vector<16x2304xbf16> to vector<16x256xbf16>
    %15 = vector.extract_strided_slice %6 {offsets = [0, 2048], sizes = [16, 256], strides = [1, 1]} : vector<16x2304xbf16> to vector<16x256xbf16>
    %16 = tpu.concatenate %7, %8, %9, %10, %11, %12, %13, %14, %15 in 0 : vector<16x256xbf16>, vector<16x256xbf16>, vector<16x256xbf16>, vector<16x256xbf16>, vector<16x256xbf16>, vector<16x256xbf16>, vector<16x256xbf16>, vector<16x256xbf16>, vector<16x256xbf16> -> vector<144x256xbf16>
    %c0_6 = arith.constant 0 : index
    %c0_7 = arith.constant 0 : index
    %17 = vector.load %arg4[%c0_6, %c0_7] : memref<36x144xbf16, #tpu.memory_space<vmem>>, vector<36x144xbf16>
    %cst_8 = arith.constant dense<0.000000e+00> : vector<36x256xf32>
    %18 = tpu.matmul %17, %16, %cst_8 {dimension_numbers = #tpu.dot_dimension_numbers<[1], [0], [0], [1], [0, 0, 1, 1], [], []>} : vector<36x144xbf16>, vector<144x256xbf16>, vector<36x256xf32> -> vector<36x256xf32>
    %c0_9 = arith.constant 0 : index
    %c0_10 = arith.constant 0 : index
    %19 = vector.load %arg3[%c0_9, %c0_10] : memref<1x256xf32, #tpu.memory_space<vmem>>, vector<1x256xf32>
    %20 = vector.broadcast %19 : vector<1x256xf32> to vector<36x256xf32>
    %21 = arith.addf %18, %20 : vector<36x256xf32>
    %c0_11 = arith.constant 0 : index
    %c0_12 = arith.constant 0 : index
    %22 = vector.load %arg5[%c0_11, %c0_12] : memref<144x36xbf16, #tpu.memory_space<vmem>>, vector<144x36xbf16>
    %23 = arith.truncf %21 : vector<36x256xf32> to vector<36x256xbf16>
    %cst_13 = arith.constant dense<0.000000e+00> : vector<144x256xf32>
    %24 = tpu.matmul %22, %23, %cst_13 {dimension_numbers = #tpu.dot_dimension_numbers<[1], [0], [0], [1], [0, 0, 1, 1], [], []>} : vector<144x36xbf16>, vector<36x256xbf16>, vector<144x256xf32> -> vector<144x256xf32>
    %c0_14 = arith.constant 0 : index
    %c0_15 = arith.constant 0 : index
    %25 = vector.load %arg6[%c0_14, %c0_15] : memref<9x256xbf16, #tpu.memory_space<vmem>>, vector<9x256xbf16>
    %26 = arith.extf %25 : vector<9x256xbf16> to vector<9x256xf32>
    %27 = vector.extract_strided_slice %24 {offsets = [0, 0], sizes = [16, 256], strides = [1, 1]} : vector<144x256xf32> to vector<16x256xf32>
    %28 = vector.extract_strided_slice %26 {offsets = [0, 0], sizes = [1, 256], strides = [1, 1]} : vector<9x256xf32> to vector<1x256xf32>
    %29 = vector.broadcast %28 : vector<1x256xf32> to vector<16x256xf32>
    %30 = arith.mulf %27, %29 : vector<16x256xf32>
    %31 = vector.extract_strided_slice %24 {offsets = [16, 0], sizes = [16, 256], strides = [1, 1]} : vector<144x256xf32> to vector<16x256xf32>
    %32 = vector.extract_strided_slice %26 {offsets = [1, 0], sizes = [1, 256], strides = [1, 1]} : vector<9x256xf32> to vector<1x256xf32>
    %33 = vector.broadcast %32 : vector<1x256xf32> to vector<16x256xf32>
    %34 = arith.mulf %31, %33 : vector<16x256xf32>
    %35 = arith.addf %30, %34 : vector<16x256xf32>
    %36 = vector.extract_strided_slice %24 {offsets = [32, 0], sizes = [16, 256], strides = [1, 1]} : vector<144x256xf32> to vector<16x256xf32>
    %37 = vector.extract_strided_slice %26 {offsets = [2, 0], sizes = [1, 256], strides = [1, 1]} : vector<9x256xf32> to vector<1x256xf32>
    %38 = vector.broadcast %37 : vector<1x256xf32> to vector<16x256xf32>
    %39 = arith.mulf %36, %38 : vector<16x256xf32>
    %40 = arith.addf %35, %39 : vector<16x256xf32>
    %41 = vector.extract_strided_slice %24 {offsets = [48, 0], sizes = [16, 256], strides = [1, 1]} : vector<144x256xf32> to vector<16x256xf32>
    %42 = vector.extract_strided_slice %26 {offsets = [3, 0], sizes = [1, 256], strides = [1, 1]} : vector<9x256xf32> to vector<1x256xf32>
    %43 = vector.broadcast %42 : vector<1x256xf32> to vector<16x256xf32>
    %44 = arith.mulf %41, %43 : vector<16x256xf32>
    %45 = arith.addf %40, %44 : vector<16x256xf32>
    %46 = vector.extract_strided_slice %24 {offsets = [64, 0], sizes = [16, 256], strides = [1, 1]} : vector<144x256xf32> to vector<16x256xf32>
    %47 = vector.extract_strided_slice %26 {offsets = [4, 0], sizes = [1, 256], strides = [1, 1]} : vector<9x256xf32> to vector<1x256xf32>
    %48 = vector.broadcast %47 : vector<1x256xf32> to vector<16x256xf32>
    %49 = arith.mulf %46, %48 : vector<16x256xf32>
    %50 = arith.addf %45, %49 : vector<16x256xf32>
    %51 = vector.extract_strided_slice %24 {offsets = [80, 0], sizes = [16, 256], strides = [1, 1]} : vector<144x256xf32> to vector<16x256xf32>
    %52 = vector.extract_strided_slice %26 {offsets = [5, 0], sizes = [1, 256], strides = [1, 1]} : vector<9x256xf32> to vector<1x256xf32>
    %53 = vector.broadcast %52 : vector<1x256xf32> to vector<16x256xf32>
    %54 = arith.mulf %51, %53 : vector<16x256xf32>
    %55 = arith.addf %50, %54 : vector<16x256xf32>
    %56 = vector.extract_strided_slice %24 {offsets = [96, 0], sizes = [16, 256], strides = [1, 1]} : vector<144x256xf32> to vector<16x256xf32>
    %57 = vector.extract_strided_slice %26 {offsets = [6, 0], sizes = [1, 256], strides = [1, 1]} : vector<9x256xf32> to vector<1x256xf32>
    %58 = vector.broadcast %57 : vector<1x256xf32> to vector<16x256xf32>
    %59 = arith.mulf %56, %58 : vector<16x256xf32>
    %60 = arith.addf %55, %59 : vector<16x256xf32>
    %61 = vector.extract_strided_slice %24 {offsets = [112, 0], sizes = [16, 256], strides = [1, 1]} : vector<144x256xf32> to vector<16x256xf32>
    %62 = vector.extract_strided_slice %26 {offsets = [7, 0], sizes = [1, 256], strides = [1, 1]} : vector<9x256xf32> to vector<1x256xf32>
    %63 = vector.broadcast %62 : vector<1x256xf32> to vector<16x256xf32>
    %64 = arith.mulf %61, %63 : vector<16x256xf32>
    %65 = arith.addf %60, %64 : vector<16x256xf32>
    %66 = vector.extract_strided_slice %24 {offsets = [128, 0], sizes = [16, 256], strides = [1, 1]} : vector<144x256xf32> to vector<16x256xf32>
    %67 = vector.extract_strided_slice %26 {offsets = [8, 0], sizes = [1, 256], strides = [1, 1]} : vector<9x256xf32> to vector<1x256xf32>
    %68 = vector.broadcast %67 : vector<1x256xf32> to vector<16x256xf32>
    %69 = arith.mulf %66, %68 : vector<16x256xf32>
    %70 = arith.addf %65, %69 : vector<16x256xf32>
    %cst_16 = arith.constant dense<0.000000e+00> : vector<16xf32>
    %71 = vector.multi_reduction <add>, %70, %cst_16 [1] : vector<16x256xf32> to vector<16xf32>
    %72 = vector.shape_cast %71 : vector<16xf32> to vector<16x1xf32>
    %c0_17 = arith.constant 0 : index
    %73 = memref.load %arg7[%c0_17] : memref<1xf32, #tpu.memory_space<smem>>
    %74 = vector.broadcast %73 : f32 to vector<16x1xf32>
    %75 = arith.addf %72, %74 : vector<16x1xf32>
    %cst_18 = arith.constant 0.000000e+00 : f32
    %76 = vector.broadcast %cst_18 : f32 to vector<16x1xf32>
    %77 = arith.subf %76, %75 : vector<16x1xf32>
    %78 = math.exp %77 : vector<16x1xf32>
    %cst_19 = arith.constant 1.000000e+00 : f32
    %79 = vector.broadcast %cst_19 : f32 to vector<16x1xf32>
    %80 = arith.addf %79, %78 : vector<16x1xf32>
    %cst_20 = arith.constant 1.000000e+00 : f32
    %81 = vector.broadcast %cst_20 : f32 to vector<16x1xf32>
    %82 = arith.divf %81, %80 : vector<16x1xf32>
    %83 = vector.broadcast %82 : vector<16x1xf32> to vector<16x256xf32>
    %84 = arith.mulf %2, %83 : vector<16x256xf32>
    %c0_21 = arith.constant 0 : index
    %c0_22 = arith.constant 0 : index
    %85 = vector.load %arg8[%c0_21, %c0_22] : memref<16x256xf32, #tpu.memory_space<vmem>>, vector<16x256xf32>
    tpu.vector_store %arg8[%c0_21, %c0_22], %84 {strides = array<i32>} : memref<16x256xf32, #tpu.memory_space<vmem>>, vector<16x256xf32>,
    return
  }
}

</mosaic_0001>

<bundles_post_ra>
// kernel: model_forward.1
= control target key start
LH: loop header
LB: loop body
LE: loop exit
PB: predicated region body
PF: predicated region fallthrough
CT: control target
= control target key end

     0   :  { %14 = vsyncpa [#allocation4], 0  ;;  %s4464_s0 = inlined_call_operand.vmem [shape: bf16[16,384], index: 0, kind: input, shape index: {}]   ;;  %s4465_s1 = inlined_call_operand.hbm [shape: bf16[384,256], index: 1, kind: input, shape index: {}]   ;;  %s4466_s2 = inlined_call_operand.hbm [shape: bf16[256,2304], index: 2, kind: input, shape index: {}]   ;;  %s4467_s3 = inlined_call_operand.hbm [shape: f32[1,256], index: 3, kind: input, shape index: {}]   ;;  %s4468_s4 = inlined_call_operand.hbm [shape: bf16[36,144], index: 4, kind: input, shape index: {}]   ;;  %s4469_s5 = inlined_call_operand.vmem [shape: bf16[144,36], index: 5, kind: input, shape index: {}]   ;;  %s4470_s6 = inlined_call_operand.hbm [shape: bf16[9,256], index: 6, kind: input, shape index: {}]   ;;  %s4471_s7 = inlined_call_operand.<no memory space> [shape: f32[1], index: 7, kind: input, shape index: {}]   ;;  %s4472_s8 = inlined_call_operand.vmem [shape: f32[16,256], index: 8, kind: output, shape index: {}]  }
   0x1   :  { %15 = vsyncpa [#allocation6], 0 }
   0x2   :  { %16 = vsyncpa [#allocation9], 0  ;;  %s4178_s27 = smov [#allocation5]   ;;  %s4062_s9 = scalar_lea.hbm %s4466_s2, 36864 }
   0x3   :  { %s36_s28 = sshll.u32 %s4178_s27, 4  ;;  %p4063_p0 = scmp.ne.s32.totalorder %s4466_s2, %s4062_s9  ;;  %s37_s28 = int_to_ptr.vmem [resolvable:$true] %s36_s28 }
   0x4   :  { %p4066_p1 = scmp.lt.u32.totalorder %s4062_s9, %s4466_s2 }
   0x6   :  { %p4068_p2 = pnand %p4066_p1, %p4063_p0 }
   0x8   :  { %4071 = shalt.err (!%p4068_p2)
}
   0x9   :  { %s4072_s14 = scalar_lea.vmem %s37_s28, 36864  ;;  %p4077_p4 = scmp.lt.s32.totalorder %s37_s28, %s37_s28 }
   0xa   :  { %p4073_p3 = scmp.ne.s32.totalorder %s37_s28, %s4072_s14  ;;  %p4078_p5 = scmp.lt.s32.totalorder %s4072_s14, %s4072_s14 }
   0xc   :  { %p4079_p6 = por %p4078_p5, %p4077_p4 }
   0xe   :  { %p4080_p7 = pnand %p4079_p6, %p4073_p3 }
  0x10   :  { %4083 = shalt.err (!%p4080_p7)
}
  0x11   :  { %s4179_s15 = smov 1152   ;;  %s4180_s16 = smov 72  }
  0x12   :  { %42 = dma.hbm_to_vmem [thread:$0]  %s4466_s2, 36864, %s37_s28, [#allocation6], %s4179_s15, %s4179_s15, %s4180_s16  }
  0x13   :  { %s4181_s19 = smov [#allocation8]   ;;  %s4182_s21 = smov [#allocation3]  }
  0x14   :  { %s58_s20 = sshll.u32 %s4181_s19, 4  ;;  %s24_s22 = sshll.u32 %s4182_s21, 4  ;;  %s59_s20 = int_to_ptr.vmem [resolvable:$true] %s58_s20  ;;  %s25_s22 = int_to_ptr.vmem [resolvable:$true] %s24_s22 }
  0x15   :  { %s4084_s25 = scalar_lea.hbm %s4468_s4, 640 }
  0x16   :  { %p4085_p8 = scmp.ne.s32.totalorder %s4468_s4, %s4084_s25  ;;  %p4088_p9 = scmp.lt.u32.totalorder %s4084_s25, %s4468_s4 }
  0x18   :  { %p4090_p10 = pnand %p4088_p9, %p4085_p8 }
  0x1a   :  { %4093 = shalt.err (!%p4090_p10)
}
  0x1b   :  { %s4094_s2 = scalar_lea.vmem %s59_s20, 640  ;;  %p4099_p12 = scmp.lt.s32.totalorder %s59_s20, %s59_s20 }
  0x1c   :  { %p4095_p11 = scmp.ne.s32.totalorder %s59_s20, %s4094_s2  ;;  %p4100_p13 = scmp.lt.s32.totalorder %s4094_s2, %s4094_s2 }
  0x1e   :  { %p4101_p0 = por %p4100_p13, %p4099_p12 }
  0x20   :  { %p4102_p1 = pnand %p4101_p0, %p4095_p11 }
  0x22   :  { %4105 = shalt.err (!%p4102_p1)
}
  0x23   :  { %s4183_s28 = smov 128   ;;  %s4184_s9 = smov 8  }
  0x24   :  { %64 = dma.hbm_to_vmem [thread:$0]  %s4468_s4, 640, %s59_s20, [#allocation9], %s4183_s28, %s4183_s28, %s4184_s9  }
  0x25   :  { %s4106_s14 = scalar_lea.hbm %s4465_s1, 6144 }
  0x26   :  { %p4107_p2 = scmp.ne.s32.totalorder %s4465_s1, %s4106_s14  ;;  %p4110_p3 = scmp.lt.u32.totalorder %s4106_s14, %s4465_s1 }
  0x28   :  { %p4112_p4 = pnand %p4110_p3, %p4107_p2 }
  0x2a   :  { %4115 = shalt.err (!%p4112_p4)
}
  0x2b   :  { %s4116_s19 = scalar_lea.vmem %s25_s22, 6144  ;;  %p4121_p6 = scmp.lt.s32.totalorder %s25_s22, %s25_s22 }
  0x2c   :  { %p4117_p5 = scmp.ne.s32.totalorder %s25_s22, %s4116_s19  ;;  %p4122_p7 = scmp.lt.s32.totalorder %s4116_s19, %s4116_s19 }
  0x2e   :  { %p4123_p8 = por %p4122_p7, %p4121_p6 }
  0x30   :  { %p4124_p9 = pnand %p4123_p8, %p4117_p5 }
  0x32   :  { %4127 = shalt.err (!%p4124_p9)
}
  0x33   :  { %30 = dma.hbm_to_vmem [thread:$0]  %s4465_s1, 6144, %s25_s22, [#allocation4], %s4183_s28, %s4183_s28, %s4184_s9  }
  0x34   :  { %s4185_s21 = smov [#allocation7]   ;;  %s4186_s24 = smov [#allocation10]  }
  0x35   :  { %s49_s23 = sshll.u32 %s4185_s21, 4  ;;  %s72_s25 = sshll.u32 %s4186_s24, 4  ;;  %s50_s23 = int_to_ptr.vmem [resolvable:$true] %s49_s23  ;;  %s73_s25 = int_to_ptr.vmem [resolvable:$true] %s72_s25 }
  0x36   :  { %s4128_s29 = scalar_lea.hbm %s4467_s3, 32 }
  0x37   :  { %p4129_p10 = scmp.ne.s32.totalorder %s4467_s3, %s4128_s29  ;;  %p4132_p11 = scmp.lt.u32.totalorder %s4128_s29, %s4467_s3 }
  0x39   :  { %p4134_p12 = pnand %p4132_p11, %p4129_p10 }
  0x3b   :  { %4137 = shalt.err (!%p4134_p12)
}
  0x3c   :  { %s4138_s1 = scalar_lea.vmem %s50_s23, 32  ;;  %p4143_p0 = scmp.lt.s32.totalorder %s50_s23, %s50_s23 }
  0x3d   :  { %p4139_p13 = scmp.ne.s32.totalorder %s50_s23, %s4138_s1  ;;  %p4144_p1 = scmp.lt.s32.totalorder %s4138_s1, %s4138_s1 }
  0x3f   :  { %p4145_p2 = por %p4144_p1, %p4143_p0 }
  0x41   :  { %p4146_p3 = pnand %p4145_p2, %p4139_p13 }
  0x43   :  { %4149 = shalt.err (!%p4146_p3)
}
  0x44   :  { %52 = dma.hbm_to_vmem [thread:$0]  %s4467_s3, 32, %s50_s23, [#allocation6]  }
  0x45   :  { %s4150_s15 = scalar_lea.hbm %s4470_s6, 256 }
  0x46   :  { %p4151_p4 = scmp.ne.s32.totalorder %s4470_s6, %s4150_s15  ;;  %p4154_p5 = scmp.lt.u32.totalorder %s4150_s15, %s4470_s6 }
  0x48   :  { %p4156_p6 = pnand %p4154_p5, %p4151_p4 }
  0x4a   :  { %4159 = shalt.err (!%p4156_p6)
}
  0x4b   :  { %s4160_s4 = scalar_lea.vmem %s73_s25, 256  ;;  %p4165_p8 = scmp.lt.s32.totalorder %s73_s25, %s73_s25 }
  0x4c   :  { %p4161_p7 = scmp.ne.s32.totalorder %s73_s25, %s4160_s4  ;;  %p4166_p9 = scmp.lt.s32.totalorder %s4160_s4, %s4160_s4 }
  0x4e   :  { %p4167_p10 = por %p4166_p9, %p4165_p8 }
  0x50   :  { %p4168_p11 = pnand %p4167_p10, %p4161_p7 }
  0x52   :  { %4171 = shalt.err (!%p4168_p11)
}
  0x53   :  { %78 = dma.hbm_to_vmem [thread:$0]  %s4470_s6, 256, %s73_s25, [#allocation9], %s4183_s28, %s4183_s28, %s4184_s9  }
  0x54   :  { %4172 = dma.done.wait [#allocation4], 6144  }
  0x55   :  { %4173 = vsyncadd [#allocation4], 4294961152 }
  0x56   :  { %4174 = dma.done.wait [#allocation6], 36896  }
  0x57   :  { %4175 = vsyncadd [#allocation6], 4294930400 }
  0x58   :  { %4176 = dma.done.wait [#allocation9], 896  }
  0x59   :  { %4177 = vsyncadd [#allocation9], 4294966400  ;;  %v4187_v0 = vmov 0   ;;  %v3529_v1 = vld [vmem:[#allocation3 + $0x4] ss:$8 sps:$4 sm:$0xff]   ;;  %vm2667_vm0 = vcmask 130048  }
  0x5a   :  { %480 = vmatprep.mubr.bf16.mxu1 %v4187_v0  ;;  %v3531_v2 = vld [vmem:[#allocation3] ss:$8 sps:$4 sm:$0xff]   ;;  %405 = vmatprep.subr.bf16.mxu0 %v3529_v1  ;;  %v3532_v3 = vld [vmem:[#allocation3 + $0x14] ss:$8 sps:$4 sm:$0xff]   ;;  %v3534_v4 = vld [vmem:[#allocation3 + $0x10] ss:$8 sps:$4 sm:$0xff]  }
  0x5b   :  { %406 = vmatpush1.bf16.msra.mxu0 %v3531_v2  ;;  %v3535_v5 = vld [vmem:[#allocation3 + $0x24] ss:$8 sps:$4 sm:$0xff]   ;;  %v3537_v6 = vld [vmem:[#allocation3 + $0x20] ss:$8 sps:$4 sm:$0xff]   ;;  %v3538_v7 = vld [vmem:[#allocation3 + $0x34] ss:$8 sps:$4 sm:$0xff]  }
  0x5c   :  { %407 = vmatprep.subr.bf16.mxu0 %v3532_v3  ;;  %v3540_v8 = vld [vmem:[#allocation3 + $0x30] ss:$8 sps:$4 sm:$0xff]   ;;  %v3553_v9 = vld [vmem:[#allocation3 + $0x104] ss:$8 sps:$4 sm:$0xff]   ;;  %v3555_v10 = vld [vmem:[#allocation3 + $0x100] ss:$8 sps:$4 sm:$0xff]  }
  0x5d   :  { %v3541_v11 = vld [vmem:[#allocation3 + $0x44] ss:$8 sps:$4 sm:$0xff]   ;;  %448 = vmatprep.subr.bf16.mxu1 %v3553_v9  ;;  %v3559_v12 = vld [vmem:[#allocation3 + $0x114] ss:$8 sps:$4 sm:$0xff]   ;;  %v3561_v13 = vld [vmem:[#allocation3 + $0x110] ss:$8 sps:$4 sm:$0xff]  }
  0x5e   :  { %449 = vmatpush1.bf16.msra.mxu1 %v3555_v10  ;;  %v3543_v14 = vld [vmem:[#allocation3 + $0x40] ss:$8 sps:$4 sm:$0xff]   ;;  %v3544_v15 = vld [vmem:[#allocation3 + $0x54] ss:$8 sps:$4 sm:$0xff]   ;;  %v3565_v16 = vld [vmem:[#allocation3 + $0x124] ss:$8 sps:$4 sm:$0xff]  }
  0x5f   :  { %408 = vmatpush1.bf16.msra.mxu0 %v3534_v4  ;;  %450 = vmatprep.subr.bf16.mxu1 %v3559_v12  ;;  %v3567_v17 = vld [vmem:[#allocation3 + $0x120] ss:$8 sps:$4 sm:$0xff]   ;;  %v3546_v18 = vld [vmem:[#allocation3 + $0x50] ss:$8 sps:$4 sm:$0xff]   ;;  %v3571_v19 = vld [vmem:[#allocation3 + $0x134] ss:$8 sps:$4 sm:$0xff]  }
  0x60   :  { %409 = vmatprep.subr.bf16.mxu0 %v3535_v5  ;;  %v3547_v20 = vld [vmem:[#allocation3 + $0x64] ss:$8 sps:$4 sm:$0xff]   ;;  %v3573_v21 = vld [vmem:[#allocation3 + $0x130] ss:$8 sps:$4 sm:$0xff]   ;;  %v3549_v22 = vld [vmem:[#allocation3 + $0x60] ss:$8 sps:$4 sm:$0xff]  }
  0x61   :  { %v3577_v23 = vld [vmem:[#allocation3 + $0x144] ss:$8 sps:$4 sm:$0xff]   ;;  %v3550_v24 = vld [vmem:[#allocation3 + $0x74] ss:$8 sps:$4 sm:$0xff]   ;;  %v3579_v25 = vld [vmem:[#allocation3 + $0x140] ss:$8 sps:$4 sm:$0xff]  }
  0x62   :  { %451 = vmatpush1.bf16.msra.mxu1 %v3561_v13  ;;  %v3552_v26 = vld [vmem:[#allocation3 + $0x70] ss:$8 sps:$4 sm:$0xff]   ;;  %v3583_v27 = vld [vmem:[#allocation3 + $0x154] ss:$8 sps:$4 sm:$0xff]   ;;  %v3556_v28 = vld [vmem:[#allocation3 + $0x84] ss:$8 sps:$4 sm:$0xff]  }
  0x63   :  { %410 = vmatpush1.bf16.msra.mxu0 %v3537_v6  ;;  %452 = vmatprep.subr.bf16.mxu1 %v3565_v16  ;;  %v3585_v29 = vld [vmem:[#allocation3 + $0x150] ss:$8 sps:$4 sm:$0xff]   ;;  %v3558_v30 = vld [vmem:[#allocation3 + $0x80] ss:$8 sps:$4 sm:$0xff]   ;;  %v3589_v31 = vld [vmem:[#allocation3 + $0x164] ss:$8 sps:$4 sm:$0xff]  }
  0x64   :  { %411 = vmatprep.subr.bf16.mxu0 %v3538_v7  ;;  %v3562_v32 = vld [vmem:[#allocation3 + $0x94] ss:$8 sps:$4 sm:$0xff]   ;;  %v3591_v33 = vld [vmem:[#allocation3 + $0x160] ss:$8 sps:$4 sm:$0xff]   ;;  %v3604_v34 = vld [vmem:[%s4464_s0 + $0x4] ss:$12 sps:$4 sm:$0xff]  }
  0x65   :  { %v3564_v35 = vld [vmem:[#allocation3 + $0x90] ss:$8 sps:$4 sm:$0xff]   ;;  %v3595_v36 = vld [vmem:[#allocation3 + $0x174] ss:$8 sps:$4 sm:$0xff]   ;;  %v3568_v37 = vld [vmem:[#allocation3 + $0xa4] ss:$8 sps:$4 sm:$0xff]   ;;  %437 = vmatprep.mubr.bf16.mxu0 %v3604_v34 }
  0x66   :  { %453 = vmatpush1.bf16.msra.mxu1 %v3567_v17  ;;  %v3597_v38 = vld [vmem:[#allocation3 + $0x170] ss:$8 sps:$4 sm:$0xff]   ;;  %v3570_v39 = vld [vmem:[#allocation3 + $0xa0] ss:$8 sps:$4 sm:$0xff]   ;;  %v3607_v40 = vld [vmem:[#allocation5 + $0x4] ss:$72 sps:$4 sm:$0xff]  }
  0x67   :  { %412 = vmatpush1.bf16.msra.mxu0 %v3540_v8  ;;  %454 = vmatprep.subr.bf16.mxu1 %v3571_v19  ;;  %v3574_v41 = vld [vmem:[#allocation3 + $0xb4] ss:$8 sps:$4 sm:$0xff]   ;;  %v3605_v43 = vld [vmem:[#allocation5] ss:$72 sps:$4 sm:$0xff]   ;;  %v3576_v44 = vld [vmem:[#allocation3 + $0xb0] ss:$8 sps:$4 sm:$0xff]  }
  0x68   :  { %413 = vmatprep.subr.bf16.mxu0 %v3541_v11  ;;  %v3601_v42 = vld [vmem:[%s4464_s0 + $0x8] ss:$12 sps:$4 sm:$0xff]   ;;  %v3580_v46 = vld [vmem:[#allocation3 + $0xc4] ss:$8 sps:$4 sm:$0xff]   ;;  %v3611_v47 = vld [vmem:[#allocation5 + $0x90] ss:$72 sps:$4 sm:$0xff]  }
  0x69   :  { %v3613_v45 = vld [vmem:[#allocation5 + $0x94] ss:$72 sps:$4 sm:$0xff]   ;;  %v3582_v48 = vld [vmem:[#allocation3 + $0xc0] ss:$8 sps:$4 sm:$0xff]   ;;  %v3619_v49 = vld [vmem:[#allocation5 + $0x124] ss:$72 sps:$4 sm:$0xff]  }
  0x6a   :  { %455 = vmatpush1.bf16.msra.mxu1 %v3573_v21  ;;  %v3586_v50 = vld [vmem:[#allocation3 + $0xd4] ss:$8 sps:$4 sm:$0xff]   ;;  %v3617_v51 = vld [vmem:[#allocation5 + $0x120] ss:$72 sps:$4 sm:$0xff]   ;;  %v3588_v52 = vld [vmem:[#allocation3 + $0xd0] ss:$8 sps:$4 sm:$0xff]  }
  0x6b   :  { %414 = vmatpush1.bf16.msra.mxu0 %v3543_v14  ;;  %456 = vmatprep.subr.bf16.mxu1 %v3577_v23  ;;  %v3625_v53 = vld [vmem:[#allocation5 + $0x1b4] ss:$72 sps:$4 sm:$0xff]   ;;  %v3592_v54 = vld [vmem:[#allocation3 + $0xe4] ss:$8 sps:$4 sm:$0xff]   ;;  %v3623_v55 = vld [vmem:[#allocation5 + $0x1b0] ss:$72 sps:$4 sm:$0xff]  }
  0x6c   :  { %415 = vmatprep.subr.bf16.mxu0 %v3544_v15  ;;  %v3594_v56 = vld [vmem:[#allocation3 + $0xe0] ss:$8 sps:$4 sm:$0xff]   ;;  %v3631_v57 = vld [vmem:[#allocation5 + $0x244] ss:$72 sps:$4 sm:$0xff]   ;;  %v3598_v58 = vld [vmem:[#allocation3 + $0xf4] ss:$8 sps:$4 sm:$0xff]  }
  0x6d   :  { %v3629_v59 = vld [vmem:[#allocation5 + $0x240] ss:$72 sps:$4 sm:$0xff]   ;;  %v3600_v60 = vld [vmem:[#allocation3 + $0xf0] ss:$8 sps:$4 sm:$0xff]   ;;  %v3637_v61 = vld [vmem:[#allocation5 + $0x2d4] ss:$72 sps:$4 sm:$0xff]  }
  0x6e   :  { %457 = vmatpush1.bf16.msra.mxu1 %v3579_v25  ;;  %v3610_v62 = vld [vmem:[#allocation5 + $0x14] ss:$72 sps:$4 sm:$0xff]   ;;  %v3602_v63 = vld [vmem:[%s4464_s0] ss:$12 sps:$4 sm:$0xff]   ;;  %v3635_v1 = vld [vmem:[#allocation5 + $0x2d0] ss:$72 sps:$4 sm:$0xff]  }
  0x6f   :  { %416 = vmatpush1.bf16.msra.mxu0 %v3546_v18  ;;  %458 = vmatprep.subr.bf16.mxu1 %v3583_v27  ;;  %v3608_v2 = vld [vmem:[#allocation5 + $0x10] ss:$72 sps:$4 sm:$0xff]   ;;  %v3643_v3 = vld [vmem:[#allocation5 + $0x364] ss:$72 sps:$4 sm:$0xff]   ;;  %v3641_v5 = vld [vmem:[#allocation5 + $0x360] ss:$72 sps:$4 sm:$0xff]  }
  0x70   :  { %417 = vmatprep.subr.bf16.mxu0 %v3547_v20  ;;  %v3616_v4 = vld [vmem:[#allocation5 + $0xa4] ss:$72 sps:$4 sm:$0xff]   ;;  %v3614_v6 = vld [vmem:[#allocation5 + $0xa0] ss:$72 sps:$4 sm:$0xff]   ;;  %v3649_v7 = vld [vmem:[#allocation5 + $0x3f4] ss:$72 sps:$4 sm:$0xff]  }
  0x71   :  { %v3622_v8 = vld [vmem:[#allocation5 + $0x134] ss:$72 sps:$4 sm:$0xff]   ;;  %v3620_v9 = vld [vmem:[#allocation5 + $0x130] ss:$72 sps:$4 sm:$0xff]   ;;  %v3628_v11 = vld [vmem:[#allocation5 + $0x1c4] ss:$72 sps:$4 sm:$0xff]  }
  0x72   :  { %459 = vmatpush1.bf16.msra.mxu1 %v3585_v29  ;;  %v3647_v10 = vld [vmem:[#allocation5 + $0x3f0] ss:$72 sps:$4 sm:$0xff]   ;;  %v3655_v12 = vld [vmem:[#allocation5 + $0x484] ss:$72 sps:$4 sm:$0xff]   ;;  %v3653_v13 = vld [vmem:[#allocation5 + $0x480] ss:$72 sps:$4 sm:$0xff]  }
  0x73   :  { %418 = vmatpush1.bf16.msra.mxu0 %v3549_v22  ;;  %460 = vmatprep.subr.bf16.mxu1 %v3589_v31  ;;  %v3626_v14 = vld [vmem:[#allocation5 + $0x1c0] ss:$72 sps:$4 sm:$0xff]   ;;  %v3661_v15 = vld [vmem:[#allocation5 + $0x514] ss:$72 sps:$4 sm:$0xff]   ;;  %v3659_v17 = vld [vmem:[#allocation5 + $0x510] ss:$72 sps:$4 sm:$0xff]  }
  0x74   :  { %419 = vmatprep.subr.bf16.mxu0 %v3550_v24  ;;  %v3634_v16 = vld [vmem:[#allocation5 + $0x254] ss:$72 sps:$4 sm:$0xff]   ;;  %v3632_v18 = vld [vmem:[#allocation5 + $0x250] ss:$72 sps:$4 sm:$0xff]   ;;  %v3667_v19 = vld [vmem:[#allocation5 + $0x5a4] ss:$72 sps:$4 sm:$0xff]  }
  0x75   :  { %v3640_v20 = vld [vmem:[#allocation5 + $0x2e4] ss:$72 sps:$4 sm:$0xff]   ;;  %v3665_v21 = vld [vmem:[#allocation5 + $0x5a0] ss:$72 sps:$4 sm:$0xff]   ;;  %v3673_v23 = vld [vmem:[#allocation5 + $0x634] ss:$72 sps:$4 sm:$0xff]  }
  0x76   :  { %461 = vmatpush1.bf16.msra.mxu1 %v3591_v33  ;;  %v3638_v22 = vld [vmem:[#allocation5 + $0x2e0] ss:$72 sps:$4 sm:$0xff]   ;;  %v3646_v24 = vld [vmem:[#allocation5 + $0x374] ss:$72 sps:$4 sm:$0xff]   ;;  %v3671_v25 = vld [vmem:[#allocation5 + $0x630] ss:$72 sps:$4 sm:$0xff]  }
  0x77   :  { %420 = vmatpush1.bf16.msra.mxu0 %v3552_v26  ;;  %462 = vmatprep.subr.bf16.mxu1 %v3595_v36  ;;  %v3644_v26 = vld [vmem:[#allocation5 + $0x370] ss:$72 sps:$4 sm:$0xff]   ;;  %v3679_v27 = vld [vmem:[#allocation5 + $0x6c4] ss:$72 sps:$4 sm:$0xff]   ;;  %v3677_v29 = vld [vmem:[#allocation5 + $0x6c0] ss:$72 sps:$4 sm:$0xff]  }
  0x78   :  { %421 = vmatprep.subr.bf16.mxu0 %v3556_v28  ;;  %v3652_v28 = vld [vmem:[#allocation5 + $0x404] ss:$72 sps:$4 sm:$0xff]   ;;  %v3685_v31 = vld [vmem:[#allocation5 + $0x754] ss:$72 sps:$4 sm:$0xff]   ;;  %v3683_v33 = vld [vmem:[#allocation5 + $0x750] ss:$72 sps:$4 sm:$0xff]  }
  0x79   :  { %v3656_v34 = vld [vmem:[#allocation5 + $0x490] ss:$72 sps:$4 sm:$0xff]   ;;  %v3662_v36 = vld [vmem:[#allocation5 + $0x520] ss:$72 sps:$4 sm:$0xff]   ;;  %vm2835_vm1 = vcmask 1041408   ;;  %vm2807_vm2 = vcmask 293888  }
  0x7a   :  { %463 = vmatpush1.bf16.msra.mxu1 %v3597_v38  ;;  %v3668_v38 = vld [vmem:[#allocation5 + $0x5b0] ss:$72 sps:$4 sm:$0xff]  }
  0x7b   :  { %422 = vmatpush1.bf16.msra.mxu0 %v3558_v30  ;;  %2221 = vmatprep.subr.bf16.mxu1 %v3607_v40  ;;  %v3650_v30 = vld [vmem:[#allocation5 + $0x400] ss:$72 sps:$4 sm:$0xff]  }
  0x7c   :  { %423 = vmatprep.subr.bf16.mxu0 %v3562_v32  ;;  %v3658_v32 = vld [vmem:[#allocation5 + $0x494] ss:$72 sps:$4 sm:$0xff]   ;;  %v3674_v40 = vld [vmem:[#allocation5 + $0x640] ss:$72 sps:$4 sm:$0xff]  }
  0x7d   :  { %481 = vmatmul.mubr.bf16.vlgmr.msra.gmra.mrb[0].mxu1 %v3601_v42  ;;  %v3680_v42 = vld [vmem:[#allocation5 + $0x6d0] ss:$72 sps:$4 sm:$0xff]  }
  0x7e   :  { %2222 = vmatpush1.bf16.msra.mxu1 %v3605_v43  ;;  %v3688_v43 = vld [vmem:[#allocation5 + $0x764] ss:$72 sps:$4 sm:$0xff]  }
  0x7f   :  { %424 = vmatpush1.bf16.msra.mxu0 %v3564_v35  ;;  %2223 = vmatprep.subr.bf16.mxu1 %v3613_v45  ;;  %v3664_v35 = vld [vmem:[#allocation5 + $0x524] ss:$72 sps:$4 sm:$0xff]  }
  0x80   :  { %425 = vmatprep.subr.bf16.mxu0 %v3568_v37  ;;  %v3670_v37 = vld [vmem:[#allocation5 + $0x5b4] ss:$72 sps:$4 sm:$0xff]   ;;  %v3691_v45 = vld [vmem:[#allocation5 + $0x7e4] ss:$72 sps:$4 sm:$0xff]  }
  0x82   :  { %2224 = vmatpush1.bf16.msra.mxu1 %v3611_v47  ;;  %v3689_v47 = vld [vmem:[#allocation5 + $0x7e0] ss:$72 sps:$4 sm:$0xff]  }
  0x83   :  { %426 = vmatpush1.bf16.msra.mxu0 %v3570_v39  ;;  %2225 = vmatprep.subr.bf16.mxu1 %v3619_v49  ;;  %v3676_v39 = vld [vmem:[#allocation5 + $0x644] ss:$72 sps:$4 sm:$0xff]   ;;  %v3697_v49 = vld [vmem:[#allocation5 + $0x874] ss:$72 sps:$4 sm:$0xff]  }
  0x84   :  { %427 = vmatprep.subr.bf16.mxu0 %v3574_v41  ;;  %v3682_v41 = vld [vmem:[#allocation5 + $0x6d4] ss:$72 sps:$4 sm:$0xff]  }
  0x86   :  { %2226 = vmatpush1.bf16.msra.mxu1 %v3617_v51  ;;  %v3695_v51 = vld [vmem:[#allocation5 + $0x870] ss:$72 sps:$4 sm:$0xff]  }
  0x87   :  { %428 = vmatpush1.bf16.msra.mxu0 %v3576_v44  ;;  %2227 = vmatprep.subr.bf16.mxu1 %v3625_v53  ;;  %v3686_v44 = vld [vmem:[#allocation5 + $0x760] ss:$72 sps:$4 sm:$0xff]   ;;  %v3703_v53 = vld [vmem:[#allocation5 + $0xc] ss:$72 sps:$4 sm:$0xff]  }
  0x88   :  { %429 = vmatprep.subr.bf16.mxu0 %v3580_v46  ;;  %v3694_v46 = vld [vmem:[#allocation5 + $0x7f4] ss:$72 sps:$4 sm:$0xff]  }
  0x8a   :  { %2228 = vmatpush1.bf16.msra.mxu1 %v3623_v55 }
  0x8b   :  { %430 = vmatpush1.bf16.msra.mxu0 %v3582_v48  ;;  %2229 = vmatprep.subr.bf16.mxu1 %v3631_v57  ;;  %v3692_v48 = vld [vmem:[#allocation5 + $0x7f0] ss:$72 sps:$4 sm:$0xff]  }
  0x8c   :  { %431 = vmatprep.subr.bf16.mxu0 %v3586_v50  ;;  %v3700_v50 = vld [vmem:[#allocation5 + $0x884] ss:$72 sps:$4 sm:$0xff]  }
  0x8e   :  { %2230 = vmatpush1.bf16.msra.mxu1 %v3629_v59 }
  0x8f   :  { %432 = vmatpush1.bf16.msra.mxu0 %v3588_v52  ;;  %2231 = vmatprep.subr.bf16.mxu1 %v3637_v61  ;;  %v3698_v52 = vld [vmem:[#allocation5 + $0x880] ss:$72 sps:$4 sm:$0xff]  }
  0x90   :  { %433 = vmatprep.subr.bf16.mxu0 %v3592_v54  ;;  %v3706_v54 = vld [vmem:[#allocation5 + $0x24] ss:$72 sps:$4 sm:$0xff]  }
  0x92   :  { %2232 = vmatpush1.bf16.msra.mxu1 %v3635_v1 }
  0x93   :  { %434 = vmatpush1.bf16.msra.mxu0 %v3594_v56  ;;  %2233 = vmatprep.subr.bf16.mxu1 %v3643_v3 }
  0x94   :  { %435 = vmatprep.subr.bf16.mxu0 %v3598_v58 }
  0x96   :  { %2234 = vmatpush1.bf16.msra.mxu1 %v3641_v5  ;;  %v3701_v5 = vld [vmem:[#allocation5 + $0x8] ss:$72 sps:$4 sm:$0xff]  }
  0x97   :  { %436 = vmatpush1.bf16.msra.mxu0 %v3600_v60  ;;  %2235 = vmatprep.subr.bf16.mxu1 %v3649_v7 }
  0x98   :  { %2307 = vmatprep.subr.bf16.mxu0 %v3610_v62 }
  0x9a   :  { %438 = vmatmul.mubr.bf16.vlgmr.msra.gmra.mrb[0].mxu0 %v3602_v63  ;;  %2236 = vmatpush1.bf16.msra.mxu1 %v3647_v10  ;;  %v3707_v10 = vld [vmem:[#allocation5 + $0x98] ss:$72 sps:$4 sm:$0xff]  }
  0x9b   :  { %2308 = vmatpush1.bf16.msra.mxu0 %v3608_v2  ;;  %2237 = vmatprep.subr.bf16.mxu1 %v3655_v12  ;;  %v3715_v12 = vld [vmem:[#allocation5 + $0x12c] ss:$72 sps:$4 sm:$0xff]  }
  0x9c   :  { %2309 = vmatprep.subr.bf16.mxu0 %v3616_v4 }
  0x9e   :  { %2238 = vmatpush1.bf16.msra.mxu1 %v3653_v13  ;;  %v3718_v13 = vld [vmem:[#allocation5 + $0x144] ss:$72 sps:$4 sm:$0xff]  }
  0x9f   :  { %2310 = vmatpush1.bf16.msra.mxu0 %v3614_v6  ;;  %2239 = vmatprep.subr.bf16.mxu1 %v3661_v15  ;;  %v3704_v6 = vld [vmem:[#allocation5 + $0x20] ss:$72 sps:$4 sm:$0xff]  }
  0xa0   :  { %2311 = vmatprep.subr.bf16.mxu0 %v3622_v8  ;;  %v3709_v8 = vld [vmem:[#allocation5 + $0x9c] ss:$72 sps:$4 sm:$0xff]   ;;  %v3716_v15 = vld [vmem:[#allocation5 + $0x140] ss:$72 sps:$4 sm:$0xff]  }
  0xa2   :  { %2240 = vmatpush1.bf16.msra.mxu1 %v3659_v17  ;;  %v3724_v17 = vld [vmem:[#allocation5 + $0x1d4] ss:$72 sps:$4 sm:$0xff]  }
  0xa3   :  { %2312 = vmatpush1.bf16.msra.mxu0 %v3620_v9  ;;  %2241 = vmatprep.subr.bf16.mxu1 %v3667_v19  ;;  %v3712_v9 = vld [vmem:[#allocation5 + $0xb4] ss:$72 sps:$4 sm:$0xff]   ;;  %v3722_v19 = vld [vmem:[#allocation5 + $0x1d0] ss:$72 sps:$4 sm:$0xff]  }
  0xa4   :  { %2313 = vmatprep.subr.bf16.mxu0 %v3628_v11  ;;  %v3710_v11 = vld [vmem:[#allocation5 + $0xb0] ss:$72 sps:$4 sm:$0xff]  }
  0xa6   :  { %2242 = vmatpush1.bf16.msra.mxu1 %v3665_v21  ;;  %v3730_v21 = vld [vmem:[#allocation5 + $0x264] ss:$72 sps:$4 sm:$0xff]  }
  0xa7   :  { %2314 = vmatpush1.bf16.msra.mxu0 %v3626_v14  ;;  %2243 = vmatprep.subr.bf16.mxu1 %v3673_v23  ;;  %v3713_v14 = vld [vmem:[#allocation5 + $0x128] ss:$72 sps:$4 sm:$0xff]  }
  0xa8   :  { %2315 = vmatprep.subr.bf16.mxu0 %v3634_v16  ;;  %v3721_v16 = vld [vmem:[#allocation5 + $0x1bc] ss:$72 sps:$4 sm:$0xff]   ;;  %v3728_v23 = vld [vmem:[#allocation5 + $0x260] ss:$72 sps:$4 sm:$0xff]  }
  0xaa   :  { %2244 = vmatpush1.bf16.msra.mxu1 %v3671_v25  ;;  %v3736_v25 = vld [vmem:[#allocation5 + $0x2f4] ss:$72 sps:$4 sm:$0xff]  }
  0xab   :  { %2316 = vmatpush1.bf16.msra.mxu0 %v3632_v18  ;;  %2245 = vmatprep.subr.bf16.mxu1 %v3679_v27  ;;  %v3719_v18 = vld [vmem:[#allocation5 + $0x1b8] ss:$72 sps:$4 sm:$0xff]  }
  0xac   :  { %2317 = vmatprep.subr.bf16.mxu0 %v3640_v20  ;;  %v3727_v20 = vld [vmem:[#allocation5 + $0x24c] ss:$72 sps:$4 sm:$0xff]   ;;  %v3734_v27 = vld [vmem:[#allocation5 + $0x2f0] ss:$72 sps:$4 sm:$0xff]  }
  0xae   :  { %2246 = vmatpush1.bf16.msra.mxu1 %v3677_v29  ;;  %v3742_v29 = vld [vmem:[#allocation5 + $0x384] ss:$72 sps:$4 sm:$0xff]  }
  0xaf   :  { %2318 = vmatpush1.bf16.msra.mxu0 %v3638_v22  ;;  %2247 = vmatprep.subr.bf16.mxu1 %v3685_v31  ;;  %v3725_v22 = vld [vmem:[#allocation5 + $0x248] ss:$72 sps:$4 sm:$0xff]  }
  0xb0   :  { %2319 = vmatprep.subr.bf16.mxu0 %v3646_v24  ;;  %v3733_v24 = vld [vmem:[#allocation5 + $0x2dc] ss:$72 sps:$4 sm:$0xff]   ;;  %v3740_v31 = vld [vmem:[#allocation5 + $0x380] ss:$72 sps:$4 sm:$0xff]  }
  0xb2   :  { %2248 = vmatpush1.bf16.msra.mxu1 %v3683_v33  ;;  %v3748_v33 = vld [vmem:[#allocation5 + $0x414] ss:$72 sps:$4 sm:$0xff]  }
  0xb3   :  { %2320 = vmatpush1.bf16.msra.mxu0 %v3644_v26  ;;  %2249 = vmatprep.subr.bf16.mxu1 %v3691_v45  ;;  %v3731_v26 = vld [vmem:[#allocation5 + $0x2d8] ss:$72 sps:$4 sm:$0xff]   ;;  %v3766_v45 = vld [vmem:[#allocation5 + $0x5c4] ss:$72 sps:$4 sm:$0xff]  }
  0xb4   :  { %2321 = vmatprep.subr.bf16.mxu0 %v3652_v28  ;;  %v3739_v28 = vld [vmem:[#allocation5 + $0x36c] ss:$72 sps:$4 sm:$0xff]  }
  0xb6   :  { %2250 = vmatpush1.bf16.msra.mxu1 %v3689_v47  ;;  %v3764_v47 = vld [vmem:[#allocation5 + $0x5c0] ss:$72 sps:$4 sm:$0xff]  }
  0xb7   :  { %2322 = vmatpush1.bf16.msra.mxu0 %v3650_v30  ;;  %2251 = vmatprep.subr.bf16.mxu1 %v3697_v49  ;;  %v3737_v30 = vld [vmem:[#allocation5 + $0x368] ss:$72 sps:$4 sm:$0xff]   ;;  %v3772_v49 = vld [vmem:[#allocation5 + $0x654] ss:$72 sps:$4 sm:$0xff]  }
  0xb8   :  { %2323 = vmatprep.subr.bf16.mxu0 %v3658_v32  ;;  %v3745_v32 = vld [vmem:[#allocation5 + $0x3fc] ss:$72 sps:$4 sm:$0xff]  }
  0xba   :  { %2252 = vmatpush1.bf16.msra.mxu1 %v3695_v51  ;;  %v3770_v51 = vld [vmem:[#allocation5 + $0x650] ss:$72 sps:$4 sm:$0xff]  }
  0xbb   :  { %2324 = vmatpush1.bf16.msra.mxu0 %v3656_v34  ;;  %2264 = vmatprep.subr.bf16.mxu1 %v3703_v53  ;;  %v3743_v34 = vld [vmem:[#allocation5 + $0x3f8] ss:$72 sps:$4 sm:$0xff]   ;;  %v3778_v53 = vld [vmem:[#allocation5 + $0x6e4] ss:$72 sps:$4 sm:$0xff]  }
  0xbc   :  { %2325 = vmatprep.subr.bf16.mxu0 %v3664_v35  ;;  %v3746_v35 = vld [vmem:[#allocation5 + $0x410] ss:$72 sps:$4 sm:$0xff]  }
  0xbf   :  { %2326 = vmatpush1.bf16.msra.mxu0 %v3662_v36  ;;  %v3751_v36 = vld [vmem:[#allocation5 + $0x48c] ss:$72 sps:$4 sm:$0xff]  }
  0xc0   :  { %2327 = vmatprep.subr.bf16.mxu0 %v3670_v37  ;;  %v3754_v37 = vld [vmem:[#allocation5 + $0x4a4] ss:$72 sps:$4 sm:$0xff]  }
  0xc3   :  { %2328 = vmatpush1.bf16.msra.mxu0 %v3668_v38  ;;  %v3749_v38 = vld [vmem:[#allocation5 + $0x488] ss:$72 sps:$4 sm:$0xff]  }
  0xc4   :  { %2329 = vmatprep.subr.bf16.mxu0 %v3676_v39  ;;  %v3752_v39 = vld [vmem:[#allocation5 + $0x4a0] ss:$72 sps:$4 sm:$0xff]  }
  0xc7   :  { %2330 = vmatpush1.bf16.msra.mxu0 %v3674_v40  ;;  %v3757_v40 = vld [vmem:[#allocation5 + $0x51c] ss:$72 sps:$4 sm:$0xff]  }
  0xc8   :  { %2331 = vmatprep.subr.bf16.mxu0 %v3682_v41  ;;  %v3760_v41 = vld [vmem:[#allocation5 + $0x534] ss:$72 sps:$4 sm:$0xff]  }
  0xcb   :  { %2332 = vmatpush1.bf16.msra.mxu0 %v3680_v42  ;;  %v3755_v42 = vld [vmem:[#allocation5 + $0x518] ss:$72 sps:$4 sm:$0xff]  }
  0xcc   :  { %2333 = vmatprep.subr.bf16.mxu0 %v3688_v43  ;;  %v3758_v43 = vld [vmem:[#allocation5 + $0x530] ss:$72 sps:$4 sm:$0xff]  }
  0xcf   :  { %2334 = vmatpush1.bf16.msra.mxu0 %v3686_v44  ;;  %v3763_v44 = vld [vmem:[#allocation5 + $0x5ac] ss:$72 sps:$4 sm:$0xff]  }
  0xd0   :  { %2335 = vmatprep.subr.bf16.mxu0 %v3694_v46  ;;  %v3761_v46 = vld [vmem:[#allocation5 + $0x5a8] ss:$72 sps:$4 sm:$0xff]  }
  0xd3   :  { %2336 = vmatpush1.bf16.msra.mxu0 %v3692_v48  ;;  %v3769_v48 = vld [vmem:[#allocation5 + $0x63c] ss:$72 sps:$4 sm:$0xff]  }
  0xd4   :  { %2337 = vmatprep.subr.bf16.mxu0 %v3700_v50  ;;  %v3767_v50 = vld [vmem:[#allocation5 + $0x638] ss:$72 sps:$4 sm:$0xff]  }
  0xd7   :  { %2338 = vmatpush1.bf16.msra.mxu0 %v3698_v52  ;;  %v3775_v52 = vld [vmem:[#allocation5 + $0x6cc] ss:$72 sps:$4 sm:$0xff]  }
  0xd8   :  { %2393 = vmatprep.subr.bf16.mxu0 %v3706_v54  ;;  %v3773_v54 = vld [vmem:[#allocation5 + $0x6c8] ss:$72 sps:$4 sm:$0xff]  }
 0x150   :  { %v482_v55 = vpop.f32.mrb[0].mxu1 }
 0x151   :  { %v484_v56 = vpop.f32.mrb[1].mxu1 }
 0x152   :  { %v486_v57 = vpop.f32.mrb[2].mxu1 }
 0x153   :  { %v488_v58 = vpop.f32.mrb[3].mxu1 }
 0x16d   :  { %v439_v59 = vpop.f32.mrb[0].mxu0 }
 0x16e   :  { %v4312_v60 = vadd.f32 %v482_v55, %v439_v59  ;;  %v441_v61 = vpop.f32.mrb[1].mxu0  ;;  %v3776_v55 = vld [vmem:[#allocation5 + $0x6e0] ss:$72 sps:$4 sm:$0xff]   ;;  %v3782_v59 = vld [vmem:[#allocation5 + $0x770] ss:$72 sps:$4 sm:$0xff]  }
 0x16f   :  { %v4314_v62 = vadd.f32 %v484_v56, %v441_v61  ;;  %v443_v63 = vpop.f32.mrb[2].mxu0  ;;  %v3781_v56 = vld [vmem:[#allocation5 + $0x75c] ss:$72 sps:$4 sm:$0xff]   ;;  %v3787_v61 = vld [vmem:[#allocation5 + $0x7ec] ss:$72 sps:$4 sm:$0xff]  }
 0x170   :  { %v4316_v1 = vadd.f32 %v486_v57, %v443_v63  ;;  %v445_v2 = vpop.f32.mrb[3].mxu0  ;;  %v3784_v57 = vld [vmem:[#allocation5 + $0x774] ss:$72 sps:$4 sm:$0xff]   ;;  %v3790_v63 = vld [vmem:[#allocation5 + $0x804] ss:$72 sps:$4 sm:$0xff]  }
 0x171   :  { %v4318_v3 = vadd.f32 %v488_v58, %v445_v2  ;;  %v3779_v58 = vld [vmem:[#allocation5 + $0x758] ss:$72 sps:$4 sm:$0xff]   ;;  %v3785_v2 = vld [vmem:[#allocation5 + $0x7e8] ss:$72 sps:$4 sm:$0xff]  }
 0x172   :  { %v4326_v7 = vpack.c.bf16 %v4316_v1, %v4312_v60 }
 0x173   :  { %v4322_v4 = vpack.c.bf16 %v4318_v3, %v4314_v62 }
 0x175   :  { %2253 = vmatprep.mubr.bf16.mxu1 %v4322_v4  ;;  %2339 = vmatprep.mubr.bf16.mxu0 %v4322_v4 }
 0x176   :  { %2254 = vmatmul.mubr.bf16.vlgmr.msra.gmra.mrb[4].mxu1 %v4326_v7  ;;  %2340 = vmatmul.mubr.bf16.vlgmr.msra.gmra.mrb[4].mxu0 %v4326_v7 }
 0x177   :  { %2265 = vmatpush1.bf16.msra.mxu1 %v3701_v5  ;;  %2394 = vmatpush1.bf16.msra.mxu0 %v3704_v6  ;;  %v3788_v5 = vld [vmem:[#allocation5 + $0x800] ss:$72 sps:$4 sm:$0xff]   ;;  %v3793_v6 = vld [vmem:[#allocation5 + $0x87c] ss:$72 sps:$4 sm:$0xff]  }
 0x178   :  { %2296 = vmatprep.mubr.bf16.mxu1 %v4322_v4  ;;  %2425 = vmatprep.mubr.bf16.mxu0 %v4322_v4 }
 0x179   :  { %2266 = vmatprep.subr.bf16.mxu1 %v3709_v8  ;;  %2395 = vmatprep.subr.bf16.mxu0 %v3712_v9  ;;  %v3796_v8 = vld [vmem:[#allocation5 + $0x894] ss:$72 sps:$4 sm:$0xff]   ;;  %v3791_v9 = vld [vmem:[#allocation5 + $0x878] ss:$72 sps:$4 sm:$0xff]  }
 0x17b   :  { %2267 = vmatpush1.bf16.msra.mxu1 %v3707_v10  ;;  %2396 = vmatpush1.bf16.msra.mxu0 %v3710_v11  ;;  %v3794_v10 = vld [vmem:[#allocation5 + $0x890] ss:$72 sps:$4 sm:$0xff]   ;;  %v3799_v11 = vld [vmem:[#allocation5 + $0x1c] ss:$72 sps:$4 sm:$0xff]  }
 0x17c   :  { %2268 = vmatprep.subr.bf16.mxu1 %v3715_v12  ;;  %2397 = vmatprep.subr.bf16.mxu0 %v3718_v13  ;;  %v3802_v12 = vld [vmem:[#allocation5 + $0x34] ss:$72 sps:$4 sm:$0xff]   ;;  %v3797_v13 = vld [vmem:[#allocation5 + $0x18] ss:$72 sps:$4 sm:$0xff]  }
 0x17f   :  { %2269 = vmatpush1.bf16.msra.mxu1 %v3713_v14  ;;  %2398 = vmatpush1.bf16.msra.mxu0 %v3716_v15  ;;  %v3800_v14 = vld [vmem:[#allocation5 + $0x30] ss:$72 sps:$4 sm:$0xff]   ;;  %v3805_v15 = vld [vmem:[#allocation5 + $0xac] ss:$72 sps:$4 sm:$0xff]  }
 0x180   :  { %2270 = vmatprep.subr.bf16.mxu1 %v3721_v16  ;;  %2399 = vmatprep.subr.bf16.mxu0 %v3724_v17  ;;  %v3808_v16 = vld [vmem:[#allocation5 + $0xc4] ss:$72 sps:$4 sm:$0xff]   ;;  %v3803_v17 = vld [vmem:[#allocation5 + $0xa8] ss:$72 sps:$4 sm:$0xff]  }
 0x183   :  { %2271 = vmatpush1.bf16.msra.mxu1 %v3719_v18  ;;  %2400 = vmatpush1.bf16.msra.mxu0 %v3722_v19  ;;  %v3806_v18 = vld [vmem:[#allocation5 + $0xc0] ss:$72 sps:$4 sm:$0xff]   ;;  %v3811_v19 = vld [vmem:[#allocation5 + $0x13c] ss:$72 sps:$4 sm:$0xff]  }
 0x184   :  { %2272 = vmatprep.subr.bf16.mxu1 %v3727_v20  ;;  %2401 = vmatprep.subr.bf16.mxu0 %v3730_v21  ;;  %v3814_v20 = vld [vmem:[#allocation5 + $0x154] ss:$72 sps:$4 sm:$0xff]   ;;  %v3809_v21 = vld [vmem:[#allocation5 + $0x138] ss:$72 sps:$4 sm:$0xff]  }
 0x187   :  { %2273 = vmatpush1.bf16.msra.mxu1 %v3725_v22  ;;  %2402 = vmatpush1.bf16.msra.mxu0 %v3728_v23  ;;  %v3812_v22 = vld [vmem:[#allocation5 + $0x150] ss:$72 sps:$4 sm:$0xff]   ;;  %v3817_v23 = vld [vmem:[#allocation5 + $0x1cc] ss:$72 sps:$4 sm:$0xff]  }
 0x188   :  { %2274 = vmatprep.subr.bf16.mxu1 %v3733_v24  ;;  %2403 = vmatprep.subr.bf16.mxu0 %v3736_v25  ;;  %v3820_v24 = vld [vmem:[#allocation5 + $0x1e4] ss:$72 sps:$4 sm:$0xff]   ;;  %v3815_v25 = vld [vmem:[#allocation5 + $0x1c8] ss:$72 sps:$4 sm:$0xff]  }
 0x18b   :  { %2275 = vmatpush1.bf16.msra.mxu1 %v3731_v26  ;;  %2404 = vmatpush1.bf16.msra.mxu0 %v3734_v27  ;;  %v3818_v26 = vld [vmem:[#allocation5 + $0x1e0] ss:$72 sps:$4 sm:$0xff]   ;;  %v3823_v27 = vld [vmem:[#allocation5 + $0x25c] ss:$72 sps:$4 sm:$0xff]  }
 0x18c   :  { %2276 = vmatprep.subr.bf16.mxu1 %v3739_v28  ;;  %2405 = vmatprep.subr.bf16.mxu0 %v3742_v29  ;;  %v3826_v28 = vld [vmem:[#allocation5 + $0x274] ss:$72 sps:$4 sm:$0xff]   ;;  %v3821_v29 = vld [vmem:[#allocation5 + $0x258] ss:$72 sps:$4 sm:$0xff]  }
 0x18f   :  { %2277 = vmatpush1.bf16.msra.mxu1 %v3737_v30  ;;  %2406 = vmatpush1.bf16.msra.mxu0 %v3740_v31  ;;  %v3824_v30 = vld [vmem:[#allocation5 + $0x270] ss:$72 sps:$4 sm:$0xff]   ;;  %v3829_v31 = vld [vmem:[#allocation5 + $0x2ec] ss:$72 sps:$4 sm:$0xff]  }
 0x190   :  { %2278 = vmatprep.subr.bf16.mxu1 %v3745_v32  ;;  %2407 = vmatprep.subr.bf16.mxu0 %v3748_v33  ;;  %v3832_v32 = vld [vmem:[#allocation5 + $0x304] ss:$72 sps:$4 sm:$0xff]   ;;  %v3827_v33 = vld [vmem:[#allocation5 + $0x2e8] ss:$72 sps:$4 sm:$0xff]  }
 0x193   :  { %2279 = vmatpush1.bf16.msra.mxu1 %v3743_v34  ;;  %2408 = vmatpush1.bf16.msra.mxu0 %v3746_v35  ;;  %v3830_v34 = vld [vmem:[#allocation5 + $0x300] ss:$72 sps:$4 sm:$0xff]   ;;  %v3835_v35 = vld [vmem:[#allocation5 + $0x37c] ss:$72 sps:$4 sm:$0xff]  }
 0x194   :  { %2280 = vmatprep.subr.bf16.mxu1 %v3751_v36  ;;  %2409 = vmatprep.subr.bf16.mxu0 %v3754_v37  ;;  %v3838_v36 = vld [vmem:[#allocation5 + $0x394] ss:$72 sps:$4 sm:$0xff]   ;;  %v3833_v37 = vld [vmem:[#allocation5 + $0x378] ss:$72 sps:$4 sm:$0xff]  }
 0x197   :  { %2281 = vmatpush1.bf16.msra.mxu1 %v3749_v38  ;;  %2410 = vmatpush1.bf16.msra.mxu0 %v3752_v39  ;;  %v3836_v38 = vld [vmem:[#allocation5 + $0x390] ss:$72 sps:$4 sm:$0xff]   ;;  %v3841_v39 = vld [vmem:[#allocation5 + $0x40c] ss:$72 sps:$4 sm:$0xff]  }
 0x198   :  { %2282 = vmatprep.subr.bf16.mxu1 %v3757_v40  ;;  %2411 = vmatprep.subr.bf16.mxu0 %v3760_v41  ;;  %v3844_v40 = vld [vmem:[#allocation5 + $0x424] ss:$72 sps:$4 sm:$0xff]   ;;  %v3839_v41 = vld [vmem:[#allocation5 + $0x408] ss:$72 sps:$4 sm:$0xff]  }
 0x19b   :  { %2283 = vmatpush1.bf16.msra.mxu1 %v3755_v42  ;;  %2412 = vmatpush1.bf16.msra.mxu0 %v3758_v43  ;;  %v3842_v42 = vld [vmem:[#allocation5 + $0x420] ss:$72 sps:$4 sm:$0xff]   ;;  %v3847_v43 = vld [vmem:[#allocation5 + $0x49c] ss:$72 sps:$4 sm:$0xff]  }
 0x19c   :  { %2284 = vmatprep.subr.bf16.mxu1 %v3763_v44  ;;  %2413 = vmatprep.subr.bf16.mxu0 %v3766_v45  ;;  %v3850_v44 = vld [vmem:[#allocation5 + $0x4b4] ss:$72 sps:$4 sm:$0xff]   ;;  %v3845_v45 = vld [vmem:[#allocation5 + $0x498] ss:$72 sps:$4 sm:$0xff]  }
 0x19f   :  { %2285 = vmatpush1.bf16.msra.mxu1 %v3761_v46  ;;  %2414 = vmatpush1.bf16.msra.mxu0 %v3764_v47  ;;  %v3848_v46 = vld [vmem:[#allocation5 + $0x4b0] ss:$72 sps:$4 sm:$0xff]   ;;  %v3853_v47 = vld [vmem:[#allocation5 + $0x52c] ss:$72 sps:$4 sm:$0xff]  }
 0x1a0   :  { %2286 = vmatprep.subr.bf16.mxu1 %v3769_v48  ;;  %2415 = vmatprep.subr.bf16.mxu0 %v3772_v49  ;;  %v3856_v48 = vld [vmem:[#allocation5 + $0x544] ss:$72 sps:$4 sm:$0xff]   ;;  %v3851_v49 = vld [vmem:[#allocation5 + $0x528] ss:$72 sps:$4 sm:$0xff]  }
 0x1a3   :  { %2287 = vmatpush1.bf16.msra.mxu1 %v3767_v50  ;;  %2416 = vmatpush1.bf16.msra.mxu0 %v3770_v51  ;;  %v3854_v50 = vld [vmem:[#allocation5 + $0x540] ss:$72 sps:$4 sm:$0xff]   ;;  %v3859_v51 = vld [vmem:[#allocation5 + $0x5bc] ss:$72 sps:$4 sm:$0xff]  }
 0x1a4   :  { %2288 = vmatprep.subr.bf16.mxu1 %v3775_v52  ;;  %2417 = vmatprep.subr.bf16.mxu0 %v3778_v53  ;;  %v3862_v52 = vld [vmem:[#allocation5 + $0x5d4] ss:$72 sps:$4 sm:$0xff]   ;;  %v3857_v53 = vld [vmem:[#allocation5 + $0x5b8] ss:$72 sps:$4 sm:$0xff]  }
 0x1a7   :  { %2289 = vmatpush1.bf16.msra.mxu1 %v3773_v54  ;;  %2418 = vmatpush1.bf16.msra.mxu0 %v3776_v55  ;;  %v3860_v54 = vld [vmem:[#allocation5 + $0x5d0] ss:$72 sps:$4 sm:$0xff]   ;;  %v3865_v55 = vld [vmem:[#allocation5 + $0x64c] ss:$72 sps:$4 sm:$0xff]  }
 0x1a8   :  { %2290 = vmatprep.subr.bf16.mxu1 %v3781_v56  ;;  %2419 = vmatprep.subr.bf16.mxu0 %v3784_v57  ;;  %v3868_v56 = vld [vmem:[#allocation5 + $0x664] ss:$72 sps:$4 sm:$0xff]   ;;  %v3863_v57 = vld [vmem:[#allocation5 + $0x648] ss:$72 sps:$4 sm:$0xff]  }
 0x1ab   :  { %2291 = vmatpush1.bf16.msra.mxu1 %v3779_v58  ;;  %2420 = vmatpush1.bf16.msra.mxu0 %v3782_v59  ;;  %v3866_v58 = vld [vmem:[#allocation5 + $0x660] ss:$72 sps:$4 sm:$0xff]   ;;  %v3871_v59 = vld [vmem:[#allocation5 + $0x6dc] ss:$72 sps:$4 sm:$0xff]  }
 0x1ac   :  { %2292 = vmatprep.subr.bf16.mxu1 %v3787_v61  ;;  %2421 = vmatprep.subr.bf16.mxu0 %v3790_v63  ;;  %v3874_v61 = vld [vmem:[#allocation5 + $0x6f4] ss:$72 sps:$4 sm:$0xff]   ;;  %v3869_v63 = vld [vmem:[#allocation5 + $0x6d8] ss:$72 sps:$4 sm:$0xff]  }
 0x1af   :  { %2293 = vmatpush1.bf16.msra.mxu1 %v3785_v2  ;;  %2422 = vmatpush1.bf16.msra.mxu0 %v3788_v5  ;;  %v3872_v2 = vld [vmem:[#allocation5 + $0x6f0] ss:$72 sps:$4 sm:$0xff]   ;;  %v3877_v5 = vld [vmem:[#allocation5 + $0x76c] ss:$72 sps:$4 sm:$0xff]  }
 0x1b0   :  { %2294 = vmatprep.subr.bf16.mxu1 %v3793_v6  ;;  %2423 = vmatprep.subr.bf16.mxu0 %v3796_v8  ;;  %v3880_v6 = vld [vmem:[#allocation5 + $0x784] ss:$72 sps:$4 sm:$0xff]   ;;  %v3875_v8 = vld [vmem:[#allocation5 + $0x768] ss:$72 sps:$4 sm:$0xff]  }
 0x1b3   :  { %2295 = vmatpush1.bf16.msra.mxu1 %v3791_v9  ;;  %2424 = vmatpush1.bf16.msra.mxu0 %v3794_v10  ;;  %v3878_v9 = vld [vmem:[#allocation5 + $0x780] ss:$72 sps:$4 sm:$0xff]   ;;  %v3883_v10 = vld [vmem:[#allocation5 + $0x7fc] ss:$72 sps:$4 sm:$0xff]  }
 0x1b4   :  { %2350 = vmatprep.subr.bf16.mxu1 %v3799_v11  ;;  %2479 = vmatprep.subr.bf16.mxu0 %v3802_v12  ;;  %v3886_v11 = vld [vmem:[#allocation5 + $0x814] ss:$72 sps:$4 sm:$0xff]   ;;  %v3881_v12 = vld [vmem:[#allocation5 + $0x7f8] ss:$72 sps:$4 sm:$0xff]  }
 0x1b6   :  { %2297 = vmatmul.mubr.bf16.vlgmr.msra.gmra.mrb[8].mxu1 %v4326_v7  ;;  %2426 = vmatmul.mubr.bf16.vlgmr.msra.gmra.mrb[8].mxu0 %v4326_v7 }
 0x1b7   :  { %2351 = vmatpush1.bf16.msra.mxu1 %v3797_v13  ;;  %2382 = vmatprep.mubr.bf16.mxu1 %v4322_v4  ;;  %v3884_v13 = vld [vmem:[#allocation5 + $0x810] ss:$72 sps:$4 sm:$0xff]  }
 0x1b8   :  { %2480 = vmatpush1.bf16.msra.mxu0 %v3800_v14  ;;  %2511 = vmatprep.mubr.bf16.mxu0 %v4322_v4  ;;  %v3889_v14 = vld [vmem:[#allocation5 + $0x88c] ss:$72 sps:$4 sm:$0xff]  }
 0x1b9   :  { %2352 = vmatprep.subr.bf16.mxu1 %v3805_v15  ;;  %2481 = vmatprep.subr.bf16.mxu0 %v3808_v16  ;;  %v3892_v15 = vld [vmem:[#allocation5 + $0x8a4] ss:$72 sps:$4 sm:$0xff]   ;;  %v3887_v16 = vld [vmem:[#allocation5 + $0x888] ss:$72 sps:$4 sm:$0xff]  }
 0x1bb   :  { %2353 = vmatpush1.bf16.msra.mxu1 %v3803_v17  ;;  %v3890_v17 = vld [vmem:[#allocation5 + $0x8a0] ss:$72 sps:$4 sm:$0xff]  }
 0x1bc   :  { %2482 = vmatpush1.bf16.msra.mxu0 %v3806_v18  ;;  %2354 = vmatprep.subr.bf16.mxu1 %v3811_v19  ;;  %v3895_v18 = vld [vmem:[#allocation5 + $0x2c] ss:$72 sps:$4 sm:$0xff]  }
 0x1bd   :  { %2483 = vmatprep.subr.bf16.mxu0 %v3814_v20  ;;  %v3898_v19 = vld [vmem:[#allocation5 + $0x44] ss:$72 sps:$4 sm:$0xff]   ;;  %v3893_v20 = vld [vmem:[#allocation5 + $0x28] ss:$72 sps:$4 sm:$0xff]  }
 0x1bf   :  { %2355 = vmatpush1.bf16.msra.mxu1 %v3809_v21  ;;  %v3896_v21 = vld [vmem:[#allocation5 + $0x40] ss:$72 sps:$4 sm:$0xff]  }
 0x1c0   :  { %2484 = vmatpush1.bf16.msra.mxu0 %v3812_v22  ;;  %2356 = vmatprep.subr.bf16.mxu1 %v3817_v23  ;;  %v3901_v22 = vld [vmem:[#allocation5 + $0xbc] ss:$72 sps:$4 sm:$0xff]  }
 0x1c1   :  { %2485 = vmatprep.subr.bf16.mxu0 %v3820_v24  ;;  %v3904_v23 = vld [vmem:[#allocation5 + $0xd4] ss:$72 sps:$4 sm:$0xff]   ;;  %v3899_v24 = vld [vmem:[#allocation5 + $0xb8] ss:$72 sps:$4 sm:$0xff]  }
 0x1c3   :  { %2357 = vmatpush1.bf16.msra.mxu1 %v3815_v25  ;;  %v3902_v25 = vld [vmem:[#allocation5 + $0xd0] ss:$72 sps:$4 sm:$0xff]  }
 0x1c4   :  { %2486 = vmatpush1.bf16.msra.mxu0 %v3818_v26  ;;  %2358 = vmatprep.subr.bf16.mxu1 %v3823_v27  ;;  %v3907_v26 = vld [vmem:[#allocation5 + $0x14c] ss:$72 sps:$4 sm:$0xff]  }
 0x1c5   :  { %2487 = vmatprep.subr.bf16.mxu0 %v3826_v28  ;;  %v3910_v27 = vld [vmem:[#allocation5 + $0x164] ss:$72 sps:$4 sm:$0xff]   ;;  %v3905_v28 = vld [vmem:[#allocation5 + $0x148] ss:$72 sps:$4 sm:$0xff]  }
 0x1c7   :  { %2359 = vmatpush1.bf16.msra.mxu1 %v3821_v29  ;;  %v3908_v29 = vld [vmem:[#allocation5 + $0x160] ss:$72 sps:$4 sm:$0xff]  }
 0x1c8   :  { %2488 = vmatpush1.bf16.msra.mxu0 %v3824_v30  ;;  %2360 = vmatprep.subr.bf16.mxu1 %v3829_v31  ;;  %v3913_v30 = vld [vmem:[#allocation5 + $0x1dc] ss:$72 sps:$4 sm:$0xff]  }
 0x1c9   :  { %2489 = vmatprep.subr.bf16.mxu0 %v3832_v32  ;;  %v3916_v31 = vld [vmem:[#allocation5 + $0x1f4] ss:$72 sps:$4 sm:$0xff]   ;;  %v3911_v32 = vld [vmem:[#allocation5 + $0x1d8] ss:$72 sps:$4 sm:$0xff]  }
 0x1cb   :  { %2361 = vmatpush1.bf16.msra.mxu1 %v3827_v33  ;;  %v3914_v33 = vld [vmem:[#allocation5 + $0x1f0] ss:$72 sps:$4 sm:$0xff]  }
 0x1cc   :  { %2490 = vmatpush1.bf16.msra.mxu0 %v3830_v34  ;;  %2362 = vmatprep.subr.bf16.mxu1 %v3835_v35  ;;  %v3919_v34 = vld [vmem:[#allocation5 + $0x26c] ss:$72 sps:$4 sm:$0xff]  }
 0x1cd   :  { %2491 = vmatprep.subr.bf16.mxu0 %v3838_v36  ;;  %v3922_v35 = vld [vmem:[#allocation5 + $0x284] ss:$72 sps:$4 sm:$0xff]   ;;  %v3917_v36 = vld [vmem:[#allocation5 + $0x268] ss:$72 sps:$4 sm:$0xff]  }
 0x1cf   :  { %2363 = vmatpush1.bf16.msra.mxu1 %v3833_v37  ;;  %v3920_v37 = vld [vmem:[#allocation5 + $0x280] ss:$72 sps:$4 sm:$0xff]  }
 0x1d0   :  { %2492 = vmatpush1.bf16.msra.mxu0 %v3836_v38  ;;  %2364 = vmatprep.subr.bf16.mxu1 %v3841_v39  ;;  %v3925_v38 = vld [vmem:[#allocation5 + $0x2fc] ss:$72 sps:$4 sm:$0xff]  }
 0x1d1   :  { %2493 = vmatprep.subr.bf16.mxu0 %v3844_v40  ;;  %v3928_v39 = vld [vmem:[#allocation5 + $0x314] ss:$72 sps:$4 sm:$0xff]   ;;  %v3923_v40 = vld [vmem:[#allocation5 + $0x2f8] ss:$72 sps:$4 sm:$0xff]  }
 0x1d3   :  { %2365 = vmatpush1.bf16.msra.mxu1 %v3839_v41  ;;  %v3926_v41 = vld [vmem:[#allocation5 + $0x310] ss:$72 sps:$4 sm:$0xff]  }
 0x1d4   :  { %2494 = vmatpush1.bf16.msra.mxu0 %v3842_v42  ;;  %2366 = vmatprep.subr.bf16.mxu1 %v3847_v43  ;;  %v3931_v42 = vld [vmem:[#allocation5 + $0x38c] ss:$72 sps:$4 sm:$0xff]  }
 0x1d5   :  { %2495 = vmatprep.subr.bf16.mxu0 %v3850_v44  ;;  %v3934_v43 = vld [vmem:[#allocation5 + $0x3a4] ss:$72 sps:$4 sm:$0xff]   ;;  %v3929_v44 = vld [vmem:[#allocation5 + $0x388] ss:$72 sps:$4 sm:$0xff]  }
 0x1d7   :  { %2367 = vmatpush1.bf16.msra.mxu1 %v3845_v45  ;;  %v3932_v45 = vld [vmem:[#allocation5 + $0x3a0] ss:$72 sps:$4 sm:$0xff]  }
 0x1d8   :  { %2496 = vmatpush1.bf16.msra.mxu0 %v3848_v46  ;;  %2368 = vmatprep.subr.bf16.mxu1 %v3853_v47  ;;  %v3937_v46 = vld [vmem:[#allocation5 + $0x41c] ss:$72 sps:$4 sm:$0xff]  }
 0x1d9   :  { %2497 = vmatprep.subr.bf16.mxu0 %v3856_v48  ;;  %v3940_v47 = vld [vmem:[#allocation5 + $0x434] ss:$72 sps:$4 sm:$0xff]   ;;  %v3935_v48 = vld [vmem:[#allocation5 + $0x418] ss:$72 sps:$4 sm:$0xff]  }
 0x1db   :  { %2369 = vmatpush1.bf16.msra.mxu1 %v3851_v49  ;;  %v3938_v49 = vld [vmem:[#allocation5 + $0x430] ss:$72 sps:$4 sm:$0xff]  }
 0x1dc   :  { %2498 = vmatpush1.bf16.msra.mxu0 %v3854_v50  ;;  %2370 = vmatprep.subr.bf16.mxu1 %v3859_v51  ;;  %v3943_v50 = vld [vmem:[#allocation5 + $0x4ac] ss:$72 sps:$4 sm:$0xff]  }
 0x1dd   :  { %2499 = vmatprep.subr.bf16.mxu0 %v3862_v52  ;;  %v3946_v51 = vld [vmem:[#allocation5 + $0x4c4] ss:$72 sps:$4 sm:$0xff]   ;;  %v3941_v52 = vld [vmem:[#allocation5 + $0x4a8] ss:$72 sps:$4 sm:$0xff]  }
 0x1df   :  { %2371 = vmatpush1.bf16.msra.mxu1 %v3857_v53  ;;  %v3944_v53 = vld [vmem:[#allocation5 + $0x4c0] ss:$72 sps:$4 sm:$0xff]  }
 0x1e0   :  { %2500 = vmatpush1.bf16.msra.mxu0 %v3860_v54  ;;  %2372 = vmatprep.subr.bf16.mxu1 %v3865_v55  ;;  %v3949_v54 = vld [vmem:[#allocation5 + $0x53c] ss:$72 sps:$4 sm:$0xff]  }
 0x1e1   :  { %2501 = vmatprep.subr.bf16.mxu0 %v3868_v56  ;;  %v3952_v55 = vld [vmem:[#allocation5 + $0x554] ss:$72 sps:$4 sm:$0xff]   ;;  %v3947_v56 = vld [vmem:[#allocation5 + $0x538] ss:$72 sps:$4 sm:$0xff]  }
 0x1e3   :  { %2373 = vmatpush1.bf16.msra.mxu1 %v3863_v57  ;;  %v3950_v57 = vld [vmem:[#allocation5 + $0x550] ss:$72 sps:$4 sm:$0xff]  }
 0x1e4   :  { %2502 = vmatpush1.bf16.msra.mxu0 %v3866_v58  ;;  %2374 = vmatprep.subr.bf16.mxu1 %v3871_v59  ;;  %v3955_v58 = vld [vmem:[#allocation5 + $0x5cc] ss:$72 sps:$4 sm:$0xff]  }
 0x1e5   :  { %2503 = vmatprep.subr.bf16.mxu0 %v3874_v61  ;;  %v3958_v59 = vld [vmem:[#allocation5 + $0x5e4] ss:$72 sps:$4 sm:$0xff]   ;;  %v3953_v61 = vld [vmem:[#allocation5 + $0x5c8] ss:$72 sps:$4 sm:$0xff]  }
 0x1e7   :  { %2375 = vmatpush1.bf16.msra.mxu1 %v3869_v63  ;;  %v3956_v63 = vld [vmem:[#allocation5 + $0x5e0] ss:$72 sps:$4 sm:$0xff]  }
 0x1e8   :  { %2504 = vmatpush1.bf16.msra.mxu0 %v3872_v2  ;;  %2376 = vmatprep.subr.bf16.mxu1 %v3877_v5  ;;  %v3961_v2 = vld [vmem:[#allocation5 + $0x65c] ss:$72 sps:$4 sm:$0xff]  }
 0x1e9   :  { %2505 = vmatprep.subr.bf16.mxu0 %v3880_v6  ;;  %v3964_v5 = vld [vmem:[#allocation5 + $0x674] ss:$72 sps:$4 sm:$0xff]   ;;  %v3959_v6 = vld [vmem:[#allocation5 + $0x658] ss:$72 sps:$4 sm:$0xff]  }
 0x1eb   :  { %2377 = vmatpush1.bf16.msra.mxu1 %v3875_v8  ;;  %v3962_v8 = vld [vmem:[#allocation5 + $0x670] ss:$72 sps:$4 sm:$0xff]  }
 0x1ec   :  { %2506 = vmatpush1.bf16.msra.mxu0 %v3878_v9  ;;  %2378 = vmatprep.subr.bf16.mxu1 %v3883_v10  ;;  %v3967_v9 = vld [vmem:[#allocation5 + $0x6ec] ss:$72 sps:$4 sm:$0xff]  }
 0x1ed   :  { %2507 = vmatprep.subr.bf16.mxu0 %v3886_v11  ;;  %v3970_v10 = vld [vmem:[#allocation5 + $0x704] ss:$72 sps:$4 sm:$0xff]   ;;  %v3965_v11 = vld [vmem:[#allocation5 + $0x6e8] ss:$72 sps:$4 sm:$0xff]  }
 0x1ef   :  { %2379 = vmatpush1.bf16.msra.mxu1 %v3881_v12  ;;  %v3968_v12 = vld [vmem:[#allocation5 + $0x700] ss:$72 sps:$4 sm:$0xff]  }
 0x1f0   :  { %2508 = vmatpush1.bf16.msra.mxu0 %v3884_v13  ;;  %2380 = vmatprep.subr.bf16.mxu1 %v3889_v14  ;;  %v3973_v13 = vld [vmem:[#allocation5 + $0x77c] ss:$72 sps:$4 sm:$0xff]  }
 0x1f1   :  { %2509 = vmatprep.subr.bf16.mxu0 %v3892_v15  ;;  %v3976_v14 = vld [vmem:[#allocation5 + $0x794] ss:$72 sps:$4 sm:$0xff]   ;;  %v3971_v15 = vld [vmem:[#allocation5 + $0x778] ss:$72 sps:$4 sm:$0xff]  }
 0x1f3   :  { %2381 = vmatpush1.bf16.msra.mxu1 %v3887_v16  ;;  %v3974_v16 = vld [vmem:[#allocation5 + $0x790] ss:$72 sps:$4 sm:$0xff]  }
 0x1f4   :  { %2510 = vmatpush1.bf16.msra.mxu0 %v3890_v17  ;;  %2436 = vmatprep.subr.bf16.mxu1 %v3895_v18  ;;  %v3979_v17 = vld [vmem:[#allocation5 + $0x80c] ss:$72 sps:$4 sm:$0xff]  }
 0x1f5   :  { %2565 = vmatprep.subr.bf16.mxu0 %v3898_v19  ;;  %v3982_v18 = vld [vmem:[#allocation5 + $0x824] ss:$72 sps:$4 sm:$0xff]   ;;  %v3977_v19 = vld [vmem:[#allocation5 + $0x808] ss:$72 sps:$4 sm:$0xff]  }
 0x1f6   :  { %2383 = vmatmul.mubr.bf16.vlgmr.msra.gmra.mrb[12].mxu1 %v4326_v7 }
 0x1f7   :  { %2512 = vmatmul.mubr.bf16.vlgmr.msra.gmra.mrb[12].mxu0 %v4326_v7  ;;  %2437 = vmatpush1.bf16.msra.mxu1 %v3893_v20  ;;  %v3980_v20 = vld [vmem:[#allocation5 + $0x820] ss:$72 sps:$4 sm:$0xff]  }
 0x1f8   :  { %2468 = vmatprep.mubr.bf16.mxu1 %v4322_v4  ;;  %2566 = vmatpush1.bf16.msra.mxu0 %v3896_v21  ;;  %v3985_v21 = vld [vmem:[#allocation5 + $0x89c] ss:$72 sps:$4 sm:$0xff]  }
 0x1f9   :  { %2597 = vmatprep.mubr.bf16.mxu0 %v4322_v4  ;;  %2438 = vmatprep.subr.bf16.mxu1 %v3901_v22  ;;  %v3988_v22 = vld [vmem:[#allocation5 + $0x8b4] ss:$72 sps:$4 sm:$0xff]  }
 0x1fa   :  { %2567 = vmatprep.subr.bf16.mxu0 %v3904_v23  ;;  %v3983_v23 = vld [vmem:[#allocation5 + $0x898] ss:$72 sps:$4 sm:$0xff]  }
 0x1fb   :  { %2439 = vmatpush1.bf16.msra.mxu1 %v3899_v24  ;;  %v3986_v24 = vld [vmem:[#allocation5 + $0x8b0] ss:$72 sps:$4 sm:$0xff]  }
 0x1fc   :  { %2568 = vmatpush1.bf16.msra.mxu0 %v3902_v25  ;;  %2440 = vmatprep.subr.bf16.mxu1 %v3907_v26  ;;  %v3991_v25 = vld [vmem:[#allocation5 + $0x3c] ss:$72 sps:$4 sm:$0xff]   ;;  %v3989_v26 = vld [vmem:[#allocation5 + $0x38] ss:$72 sps:$4 sm:$0xff]  }
 0x1fd   :  { %2569 = vmatprep.subr.bf16.mxu0 %v3910_v27  ;;  %v3994_v27 = vld [vmem:[#allocation5 + $0xcc] ss:$72 sps:$4 sm:$0xff]  }
 0x1ff   :  { %2441 = vmatpush1.bf16.msra.mxu1 %v3905_v28  ;;  %v3992_v28 = vld [vmem:[#allocation5 + $0xc8] ss:$72 sps:$4 sm:$0xff]  }
 0x200   :  { %2570 = vmatpush1.bf16.msra.mxu0 %v3908_v29  ;;  %2442 = vmatprep.subr.bf16.mxu1 %v3913_v30  ;;  %v3997_v29 = vld [vmem:[#allocation5 + $0x15c] ss:$72 sps:$4 sm:$0xff]   ;;  %v3995_v30 = vld [vmem:[#allocation5 + $0x158] ss:$72 sps:$4 sm:$0xff]  }
 0x201   :  { %2571 = vmatprep.subr.bf16.mxu0 %v3916_v31  ;;  %v4000_v31 = vld [vmem:[#allocation5 + $0x1ec] ss:$72 sps:$4 sm:$0xff]  }
 0x203   :  { %2443 = vmatpush1.bf16.msra.mxu1 %v3911_v32  ;;  %v3998_v32 = vld [vmem:[#allocation5 + $0x1e8] ss:$72 sps:$4 sm:$0xff]  }
 0x204   :  { %2572 = vmatpush1.bf16.msra.mxu0 %v3914_v33  ;;  %2444 = vmatprep.subr.bf16.mxu1 %v3919_v34  ;;  %v4003_v33 = vld [vmem:[#allocation5 + $0x27c] ss:$72 sps:$4 sm:$0xff]   ;;  %v4001_v34 = vld [vmem:[#allocation5 + $0x278] ss:$72 sps:$4 sm:$0xff]  }
 0x205   :  { %2573 = vmatprep.subr.bf16.mxu0 %v3922_v35  ;;  %v4006_v35 = vld [vmem:[#allocation5 + $0x30c] ss:$72 sps:$4 sm:$0xff]  }
 0x207   :  { %2445 = vmatpush1.bf16.msra.mxu1 %v3917_v36  ;;  %v4004_v36 = vld [vmem:[#allocation5 + $0x308] ss:$72 sps:$4 sm:$0xff]  }
 0x208   :  { %2574 = vmatpush1.bf16.msra.mxu0 %v3920_v37  ;;  %2446 = vmatprep.subr.bf16.mxu1 %v3925_v38 }
 0x209   :  { %2575 = vmatprep.subr.bf16.mxu0 %v3928_v39 }
 0x20b   :  { %2447 = vmatpush1.bf16.msra.mxu1 %v3923_v40 }
 0x20c   :  { %2576 = vmatpush1.bf16.msra.mxu0 %v3926_v41  ;;  %2448 = vmatprep.subr.bf16.mxu1 %v3931_v42 }
 0x20d   :  { %2577 = vmatprep.subr.bf16.mxu0 %v3934_v43  ;;  %v4007_v43 = vld [vmem:[#allocation5 + $0x398] ss:$72 sps:$4 sm:$0xff]  }
 0x20f   :  { %2449 = vmatpush1.bf16.msra.mxu1 %v3929_v44 }
 0x210   :  { %2578 = vmatpush1.bf16.msra.mxu0 %v3932_v45  ;;  %2450 = vmatprep.subr.bf16.mxu1 %v3937_v46 }
 0x211   :  { %2579 = vmatprep.subr.bf16.mxu0 %v3940_v47 }
 0x213   :  { %2451 = vmatpush1.bf16.msra.mxu1 %v3935_v48  ;;  %v4012_v48 = vld [vmem:[#allocation5 + $0x42c] ss:$72 sps:$4 sm:$0xff]  }
 0x214   :  { %2580 = vmatpush1.bf16.msra.mxu0 %v3938_v49  ;;  %2452 = vmatprep.subr.bf16.mxu1 %v3943_v50 }
 0x215   :  { %2581 = vmatprep.subr.bf16.mxu0 %v3946_v51  ;;  %v4010_v51 = vld [vmem:[#allocation5 + $0x428] ss:$72 sps:$4 sm:$0xff]  }
 0x217   :  { %2453 = vmatpush1.bf16.msra.mxu1 %v3941_v52  ;;  %v4015_v52 = vld [vmem:[#allocation5 + $0x4bc] ss:$72 sps:$4 sm:$0xff]  }
 0x218   :  { %2582 = vmatpush1.bf16.msra.mxu0 %v3944_v53  ;;  %2454 = vmatprep.subr.bf16.mxu1 %v3949_v54  ;;  %v4013_v53 = vld [vmem:[#allocation5 + $0x4b8] ss:$72 sps:$4 sm:$0xff]   ;;  %v4018_v54 = vld [vmem:[#allocation5 + $0x54c] ss:$72 sps:$4 sm:$0xff]  }
 0x219   :  { %2583 = vmatprep.subr.bf16.mxu0 %v3952_v55  ;;  %v4016_v55 = vld [vmem:[#allocation5 + $0x548] ss:$72 sps:$4 sm:$0xff]  }
 0x21b   :  { %2455 = vmatpush1.bf16.msra.mxu1 %v3947_v56  ;;  %v4021_v56 = vld [vmem:[#allocation5 + $0x5dc] ss:$72 sps:$4 sm:$0xff]  }
 0x21c   :  { %2584 = vmatpush1.bf16.msra.mxu0 %v3950_v57  ;;  %2456 = vmatprep.subr.bf16.mxu1 %v3955_v58  ;;  %v4019_v57 = vld [vmem:[#allocation5 + $0x5d8] ss:$72 sps:$4 sm:$0xff]   ;;  %v4024_v58 = vld [vmem:[#allocation5 + $0x66c] ss:$72 sps:$4 sm:$0xff]  }
 0x21d   :  { %2585 = vmatprep.subr.bf16.mxu0 %v3958_v59  ;;  %v4022_v59 = vld [vmem:[#allocation5 + $0x668] ss:$72 sps:$4 sm:$0xff]  }
 0x21f   :  { %2457 = vmatpush1.bf16.msra.mxu1 %v3953_v61  ;;  %v4027_v61 = vld [vmem:[#allocation5 + $0x6fc] ss:$72 sps:$4 sm:$0xff]  }
 0x220   :  { %2586 = vmatpush1.bf16.msra.mxu0 %v3956_v63  ;;  %2458 = vmatprep.subr.bf16.mxu1 %v3961_v2  ;;  %v4025_v63 = vld [vmem:[#allocation5 + $0x6f8] ss:$72 sps:$4 sm:$0xff]   ;;  %v4030_v2 = vld [vmem:[#allocation5 + $0x78c] ss:$72 sps:$4 sm:$0xff]  }
 0x221   :  { %2587 = vmatprep.subr.bf16.mxu0 %v3964_v5  ;;  %v4028_v5 = vld [vmem:[#allocation5 + $0x788] ss:$72 sps:$4 sm:$0xff]  }
 0x223   :  { %2459 = vmatpush1.bf16.msra.mxu1 %v3959_v6  ;;  %v4033_v6 = vld [vmem:[#allocation5 + $0x81c] ss:$72 sps:$4 sm:$0xff]  }
 0x224   :  { %2588 = vmatpush1.bf16.msra.mxu0 %v3962_v8  ;;  %2460 = vmatprep.subr.bf16.mxu1 %v3967_v9  ;;  %v4031_v8 = vld [vmem:[#allocation5 + $0x818] ss:$72 sps:$4 sm:$0xff]   ;;  %v4036_v9 = vld [vmem:[#allocation5 + $0x8ac] ss:$72 sps:$4 sm:$0xff]  }
 0x225   :  { %2589 = vmatprep.subr.bf16.mxu0 %v3970_v10  ;;  %v4034_v10 = vld [vmem:[#allocation5 + $0x8a8] ss:$72 sps:$4 sm:$0xff]  }
 0x227   :  { %2461 = vmatpush1.bf16.msra.mxu1 %v3965_v11 }
 0x228   :  { %2590 = vmatpush1.bf16.msra.mxu0 %v3968_v12  ;;  %2462 = vmatprep.subr.bf16.mxu1 %v3973_v13 }
 0x229   :  { %2591 = vmatprep.subr.bf16.mxu0 %v3976_v14 }
 0x22b   :  { %2463 = vmatpush1.bf16.msra.mxu1 %v3971_v15 }
 0x22c   :  { %2592 = vmatpush1.bf16.msra.mxu0 %v3974_v16  ;;  %2464 = vmatprep.subr.bf16.mxu1 %v3979_v17 }
 0x22d   :  { %2593 = vmatprep.subr.bf16.mxu0 %v3982_v18 }
 0x22f   :  { %2465 = vmatpush1.bf16.msra.mxu1 %v3977_v19 }
 0x230   :  { %2594 = vmatpush1.bf16.msra.mxu0 %v3980_v20  ;;  %2466 = vmatprep.subr.bf16.mxu1 %v3985_v21 }
 0x231   :  { %2595 = vmatprep.subr.bf16.mxu0 %v3988_v22 }
 0x233   :  { %2467 = vmatpush1.bf16.msra.mxu1 %v3983_v23 }
 0x234   :  { %2596 = vmatpush1.bf16.msra.mxu0 %v3986_v24  ;;  %2522 = vmatprep.subr.bf16.mxu1 %v3991_v25 }
 0x236   :  { %2469 = vmatmul.mubr.bf16.vlgmr.msra.gmra.mrb[16].mxu1 %v4326_v7 }
 0x237   :  { %2598 = vmatmul.mubr.bf16.vlgmr.msra.gmra.mrb[16].mxu0 %v4326_v7  ;;  %2523 = vmatpush1.bf16.msra.mxu1 %v3989_v26 }
 0x238   :  { %2554 = vmatprep.mubr.bf16.mxu1 %v4322_v4  ;;  %2524 = vmatprep.subr.bf16.mxu1 %v3994_v27  ;;  %v4009_v4 = vld [vmem:[#allocation5 + $0x39c] ss:$72 sps:$4 sm:$0xff]  }
 0x239   :  { %2874 = vmatprep.mubr.bf16.mxu0 %v4187_v0 }
 0x23b   :  { %2525 = vmatpush1.bf16.msra.mxu1 %v3992_v28 }
 0x23c   :  { %2526 = vmatprep.subr.bf16.mxu1 %v3997_v29 }
 0x23f   :  { %2527 = vmatpush1.bf16.msra.mxu1 %v3995_v30 }
 0x240   :  { %2528 = vmatprep.subr.bf16.mxu1 %v4000_v31 }
 0x243   :  { %2529 = vmatpush1.bf16.msra.mxu1 %v3998_v32 }
 0x244   :  { %2530 = vmatprep.subr.bf16.mxu1 %v4003_v33 }
 0x247   :  { %2531 = vmatpush1.bf16.msra.mxu1 %v4001_v34  ;;  %v4037_v34 = vld [vmem:[#allocation8 + $0x4] ss:$8 sps:$4 sm:$0xff]  }
 0x248   :  { %2532 = vmatprep.subr.bf16.mxu1 %v4006_v35 }
 0x249   :  { %v2255_v37 = vpop.f32.mrb[4].mxu1  ;;  %v4346_v38 = vpop.f32.mrb[4].mxu0 }
 0x24a   :  { %v2257_v39 = vpop.f32.mrb[5].mxu1  ;;  %v4348_v40 = vpop.f32.mrb[5].mxu0 }
 0x24b   :  { %2533 = vmatpush1.bf16.msra.mxu1 %v4004_v36  ;;  %v2259_v41 = vpop.f32.mrb[6].mxu1  ;;  %v4350_v42 = vpop.f32.mrb[6].mxu0 }
 0x24c   :  { %v2608_v44 = vpack.c.bf16 %v2259_v41, %v2255_v37  ;;  %v2612_v45 = vpack.c.bf16 %v4350_v42, %v4346_v38  ;;  %v2261_v46 = vpop.f32.mrb[7].mxu1  ;;  %v2347_v47 = vpop.f32.mrb[7].mxu0  ;;  %2534 = vmatprep.subr.bf16.mxu1 %v4009_v4 }
 0x24d   :  { %v2609_v49 = vpack.c.bf16 %v2261_v46, %v2257_v39  ;;  %v2613_v50 = vpack.c.bf16 %v2347_v47, %v4348_v40 }
 0x24f   :  { %2535 = vmatpush1.bf16.msra.mxu1 %v4007_v43 }
 0x250   :  { %2536 = vmatprep.subr.bf16.mxu1 %v4012_v48 }
 0x253   :  { %2537 = vmatpush1.bf16.msra.mxu1 %v4010_v51 }
 0x254   :  { %2538 = vmatprep.subr.bf16.mxu1 %v4015_v52  ;;  %v4039_v52 = vld [vmem:[#allocation8] ss:$8 sps:$4 sm:$0xff]  }
 0x257   :  { %2539 = vmatpush1.bf16.msra.mxu1 %v4013_v53  ;;  %v4040_v53 = vld [vmem:[#allocation8 + $0x14] ss:$8 sps:$4 sm:$0xff]  }
 0x258   :  { %2540 = vmatprep.subr.bf16.mxu1 %v4018_v54  ;;  %v2630_v54 = vld [vmem:[#allocation8 + $0x20] sm:$0x33] }
 0x25b   :  { %2541 = vmatpush1.bf16.msra.mxu1 %v4016_v55  ;;  %v4042_v55 = vld [vmem:[#allocation8 + $0x10] ss:$8 sps:$4 sm:$0xff]  }
 0x25c   :  { %2542 = vmatprep.subr.bf16.mxu1 %v4021_v56  ;;  %v3492_v56 = vcombine.high %v2630_v54, %v2630_v54 }
 0x25f   :  { %2543 = vmatpush1.bf16.msra.mxu1 %v4019_v57  ;;  %v3491_v57 = vcombine.low %v2630_v54, %v2630_v54 }
 0x260   :  { %2544 = vmatprep.subr.bf16.mxu1 %v4024_v58  ;;  %v2633_v58 = vlaneseq }
 0x263   :  { %2545 = vmatpush1.bf16.msra.mxu1 %v4022_v59  ;;  %v4359_v59 = vshrl.u32 %v2633_v58, 7 }
 0x264   :  { %2546 = vmatprep.subr.bf16.mxu1 %v4027_v61 }
 0x265   :  { %v4362_v61 = vsub.s32 0, %v4359_v59  ;;  %v3001_v58 = vsub.s32 2, %v4359_v59 }
 0x267   :  { %2547 = vmatpush1.bf16.msra.mxu1 %v4025_v63  ;;  %v2631_v63 = vld [vmem:[#allocation7] sm:$0x3] }
 0x268   :  { %2548 = vmatprep.subr.bf16.mxu1 %v4030_v2  ;;  %v4365_v2 = vsub.s32 1, %v4359_v59 }
 0x26b   :  { %2549 = vmatpush1.bf16.msra.mxu1 %v4028_v5  ;;  %v2636_v5 = vrot.slane %v2631_v63, %v4362_v61 }
 0x26c   :  { %2550 = vmatprep.subr.bf16.mxu1 %v4033_v6 }
 0x26f   :  { %2551 = vmatpush1.bf16.msra.mxu1 %v4031_v8  ;;  %v2640_v8 = vrot.slane %v2631_v63, %v4365_v2 }
 0x270   :  { %2552 = vmatprep.subr.bf16.mxu1 %v4036_v9 }
 0x273   :  { %2553 = vmatpush1.bf16.msra.mxu1 %v4034_v10 }
 0x274   :  { %2677 = vmatprep.subr.bf16.mxu1 %v2609_v49 }
 0x276   :  { %2555 = vmatmul.mubr.bf16.vlgmr.msra.gmra.mrb[20].mxu1 %v4326_v7 }
 0x277   :  { %2678 = vmatpush1.bf16.msra.mxu1 %v2608_v44  ;;  %3493 = vmatprep.mubr.msk.bf16.mxu1 %vm2667_vm0, %v4037_v34 }
 0x289   :  { %v2298_v11 = vpop.f32.mrb[8].mxu1  ;;  %v2427_v12 = vpop.f32.mrb[8].mxu0 }
 0x28a   :  { %v2300_v13 = vpop.f32.mrb[9].mxu1  ;;  %v2429_v14 = vpop.f32.mrb[9].mxu0 }
 0x28b   :  { %v2302_v15 = vpop.f32.mrb[10].mxu1  ;;  %v2431_v16 = vpop.f32.mrb[10].mxu0 }
 0x28c   :  { %v2610_v17 = vpack.c.bf16 %v2302_v15, %v2298_v11  ;;  %v2616_v18 = vpack.c.bf16 %v2431_v16, %v2427_v12  ;;  %v2304_v19 = vpop.f32.mrb[11].mxu1  ;;  %v2433_v20 = vpop.f32.mrb[11].mxu0 }
 0x28d   :  { %v2611_v21 = vpack.c.bf16 %v2304_v19, %v2300_v13  ;;  %v2617_v22 = vpack.c.bf16 %v2433_v20, %v2429_v14 }
 0x28f   :  { %2679 = vmatprep.subr.bf16.mxu1 %v2611_v21 }
 0x290   :  { %2680 = vmatpush1.bf16.msra.mxu1 %v2610_v17 }
 0x291   :  { %2681 = vmatprep.subr.bf16.mxu1 %v2613_v50 }
 0x294   :  { %2682 = vmatpush1.bf16.msra.mxu1 %v2612_v45 }
 0x2c9   :  { %v2384_v23 = vpop.f32.mrb[12].mxu1 }
 0x2ca   :  { %v2513_v24 = vpop.f32.mrb[12].mxu0  ;;  %v2386_v7 = vpop.f32.mrb[13].mxu1 }
 0x2cb   :  { %v2515_v25 = vpop.f32.mrb[13].mxu0  ;;  %v2388_v26 = vpop.f32.mrb[14].mxu1 }
 0x2cc   :  { %v2614_v27 = vpack.c.bf16 %v2388_v26, %v2384_v23  ;;  %v2517_v28 = vpop.f32.mrb[14].mxu0  ;;  %v2390_v29 = vpop.f32.mrb[15].mxu1 }
 0x2cd   :  { %v2620_v30 = vpack.c.bf16 %v2517_v28, %v2513_v24  ;;  %v2615_v31 = vpack.c.bf16 %v2390_v29, %v2386_v7  ;;  %v2519_v32 = vpop.f32.mrb[15].mxu0 }
 0x2ce   :  { %v2621_v33 = vpack.c.bf16 %v2519_v32, %v2515_v25 }
 0x2cf   :  { %2683 = vmatprep.subr.bf16.mxu1 %v2615_v31 }
 0x2d0   :  { %2684 = vmatpush1.bf16.msra.mxu1 %v2614_v27 }
 0x2d1   :  { %2685 = vmatprep.subr.bf16.mxu1 %v2617_v22 }
 0x2d4   :  { %2686 = vmatpush1.bf16.msra.mxu1 %v2616_v18 }
 0x309   :  { %v2470_v35 = vpop.f32.mrb[16].mxu1 }
 0x30a   :  { %v2599_v36 = vpop.f32.mrb[16].mxu0  ;;  %v2472_v4 = vpop.f32.mrb[17].mxu1 }
 0x30b   :  { %v2601_v37 = vpop.f32.mrb[17].mxu0  ;;  %v2474_v38 = vpop.f32.mrb[18].mxu1 }
 0x30c   :  { %v2618_v39 = vpack.c.bf16 %v2474_v38, %v2470_v35  ;;  %v2603_v40 = vpop.f32.mrb[18].mxu0  ;;  %v2476_v41 = vpop.f32.mrb[19].mxu1  ;;  %v4048_v38 = vld [vmem:[%s4469_s5 + $0x18] sm:$0xff]  }
 0x30d   :  { %v2624_v42 = vpack.c.bf16 %v2603_v40, %v2599_v36  ;;  %v2619_v43 = vpack.c.bf16 %v2476_v41, %v2472_v4  ;;  %v2605_v44 = vpop.f32.mrb[19].mxu0  ;;  %v4045_v36 = vld [vmem:[%s4469_s5] sm:$0xff]   ;;  %v4046_v4 = vld [vmem:[%s4469_s5 + $0x8] sm:$0xff]   ;;  %v4051_v41 = vld [vmem:[%s4469_s5 + $0x30] sm:$0xff]  }
 0x30e   :  { %v2625_v45 = vpack.c.bf16 %v2605_v44, %v2601_v37  ;;  %v4047_v37 = vld [vmem:[%s4469_s5 + $0x10] sm:$0xff]   ;;  %v4050_v40 = vld [vmem:[%s4469_s5 + $0x28] sm:$0xff]  }
 0x30f   :  { %2687 = vmatprep.subr.bf16.mxu1 %v2619_v43  ;;  %v4053_v43 = vld [vmem:[%s4469_s5 + $0x40] sm:$0xff]   ;;  %v2965_v44 = vld [vmem:[#allocation10] sm:$0xff] }
 0x310   :  { %2688 = vmatpush1.bf16.msra.mxu1 %v2618_v39  ;;  %v4049_v39 = vld [vmem:[%s4469_s5 + $0x20] sm:$0xff]  }
 0x311   :  { %2689 = vmatprep.subr.bf16.mxu1 %v2621_v33 }
 0x314   :  { %2690 = vmatpush1.bf16.msra.mxu1 %v2620_v30 }
 0x349   :  { %v2556_v46 = vpop.f32.mrb[20].mxu1 }
 0x34a   :  { %v2558_v47 = vpop.f32.mrb[21].mxu1 }
 0x34b   :  { %v2560_v48 = vpop.f32.mrb[22].mxu1 }
 0x34c   :  { %v2622_v49 = vpack.c.bf16 %v2560_v48, %v2556_v46  ;;  %v2562_v50 = vpop.f32.mrb[23].mxu1  ;;  %v4413_v46 = vunpack.c.l.bf16 %v2965_v44  ;;  %v4415_v48 = vunpack.c.h.bf16 %v2965_v44 }
 0x34d   :  { %v2623_v51 = vpack.c.bf16 %v2562_v50, %v2558_v47 }
 0x34f   :  { %2691 = vmatprep.subr.bf16.mxu1 %v2623_v51  ;;  %v2974_v51 = vrot.slane %v4413_v46, %v4362_v61 }
 0x350   :  { %2692 = vmatpush1.bf16.msra.mxu1 %v2622_v49 }
 0x351   :  { %2693 = vmatprep.subr.bf16.mxu1 %v2625_v45 }
 0x354   :  { %2694 = vmatpush1.bf16.msra.mxu1 %v2624_v42  ;;  %v4052_v42 = vld [vmem:[%s4469_s5 + $0x38] sm:$0xff]  }
 0x357   :  { %2710 = vmatmul.mubr.bf16.vlgmr.msra.gmra.mrb[24].mxu1 %v4039_v52  ;;  %v2978_v52 = vrot.slane %v4415_v48, %v4362_v61 }
 0x358   :  { %3494 = vmatprep.mubr.msk.bf16.mxu1 %vm2667_vm0, %v4040_v53  ;;  %v2990_v53 = vrot.slane %v4415_v48, %v4365_v2 }
 0x35f   :  { %2720 = vmatmul.mubr.bf16.gmra.mrb[28].mxu1 %v4042_v55 }
 0x360   :  { %3495 = vmatprep.mubr.msk.bf16.mxu1 %vm2667_vm0, %v3492_v56 }
 0x367   :  { %2730 = vmatmul.mubr.bf16.gmra.mrb[32].mxu1 %v3491_v57 }
 0x42a   :  { %v2711_v6 = vpop.f32.mrb[24].mxu1 }
 0x42b   :  { %v2713_v9 = vpop.f32.mrb[25].mxu1  ;;  %v2712_v11 = vadd.f32 %v2711_v6, %v2636_v5 }
 0x42c   :  { %v2715_v10 = vpop.f32.mrb[26].mxu1  ;;  %v2714_v14 = vadd.f32 %v2713_v9, %v2640_v8 }
 0x42d   :  { %v2716_v12 = vadd.f32 %v2715_v10, %v2636_v5  ;;  %v2717_v13 = vpop.f32.mrb[27].mxu1 }
 0x42e   :  { %v2718_v15 = vadd.f32 %v2717_v13, %v2640_v8 }
 0x42f   :  { %v2756_v16 = vpack.c.bf16 %v2716_v12, %v2712_v11 }
 0x430   :  { %v2757_v17 = vpack.c.bf16 %v2718_v15, %v2714_v14 }
 0x432   :  { %v2721_v18 = vpop.f32.mrb[28].mxu1  ;;  %2842 = vmatprep.subr.bf16.mxu0 %v2757_v17  ;;  %v3006_v17 = vrot.slane %v4415_v48, %v3001_v58 }
 0x433   :  { %v2723_v19 = vpop.f32.mrb[29].mxu1  ;;  %2843 = vmatpush1.bf16.msra.mxu0 %v2756_v16  ;;  %v2722_v21 = vadd.f32 %v2721_v18, %v2636_v5  ;;  %v3002_v16 = vrot.slane %v4413_v46, %v3001_v58 }
 0x434   :  { %v2725_v20 = vpop.f32.mrb[30].mxu1  ;;  %v2724_v24 = vadd.f32 %v2723_v19, %v2640_v8 }
 0x435   :  { %v2726_v22 = vadd.f32 %v2725_v20, %v2636_v5  ;;  %v2727_v23 = vpop.f32.mrb[31].mxu1 }
 0x436   :  { %v2728_v7 = vadd.f32 %v2727_v23, %v2640_v8 }
 0x437   :  { %v2758_v25 = vpack.c.bf16 %v2726_v22, %v2722_v21  ;;  %v3017_v21 = vsub.s32 3, %v4359_v59 }
 0x438   :  { %v2759_v26 = vpack.c.bf16 %v2728_v7, %v2724_v24 }
 0x43a   :  { %v2731_v27 = vpop.f32.mrb[32].mxu1  ;;  %2844 = vmatprep.subr.bf16.mxu0 %v2759_v26 }
 0x43b   :  { %v2732_v28 = vadd.f32 %v2731_v27, %v2636_v5  ;;  %v2733_v29 = vpop.f32.mrb[33].mxu1  ;;  %2845 = vmatpush1.bf16.msra.mxu0 %v2758_v25 }
 0x43c   :  { %v2734_v30 = vadd.f32 %v2733_v29, %v2640_v8  ;;  %v2735_v31 = vpop.f32.mrb[34].mxu1  ;;  %v3018_v29 = vrot.slane %v4413_v46, %v3017_v21 }
 0x43d   :  { %v2760_v32 = vpack.c.bf16 %v2732_v28, %v2732_v28  ;;  %v2736_v33 = vpop.f32.mrb[35].mxu1  ;;  %v3022_v31 = vrot.slane %v4415_v48, %v3017_v21 }
 0x43e   :  { %v2761_v34 = vpack.c.bf16 %v2734_v30, %v2734_v30 }
 0x43f   :  { %v2837_v35 = vsel %vm2835_vm1, %v2760_v32, 0 }
 0x440   :  { %3505 = vmatprep.subr.msk.bf16.mxu0 %vm2835_vm1, %v2761_v34 }
 0x441   :  { %2847 = vmatpush1.bf16.msra.mxu0 %v2837_v35  ;;  %v3033_v35 = vsub.s32 4, %v4359_v59 }
 0x444   :  { %3506 = vmatmul.mubr.msk.bf16.vlgmr.msra.gmra.mrb[20].mxu0 %vm2807_vm2, %v4045_v36 }
 0x445   :  { %2884 = vmatprep.mubr.bf16.mxu0 %v4187_v0 }
 0x44c   :  { %3507 = vmatmul.mubr.msk.bf16.gmra.mrb[24].mxu0 %vm2807_vm2, %v4046_v4 }
 0x44d   :  { %2894 = vmatprep.mubr.bf16.mxu0 %v4187_v0 }
 0x454   :  { %3508 = vmatmul.mubr.msk.bf16.gmra.mrb[28].mxu0 %vm2807_vm2, %v4047_v37 }
 0x455   :  { %2904 = vmatprep.mubr.bf16.mxu0 %v4187_v0 }
 0x45c   :  { %3509 = vmatmul.mubr.msk.bf16.gmra.mrb[32].mxu0 %vm2807_vm2, %v4048_v38 }
 0x45d   :  { %2914 = vmatprep.mubr.bf16.mxu0 %v4187_v0 }
 0x464   :  { %3510 = vmatmul.mubr.msk.bf16.gmra.mrb[36].mxu0 %vm2807_vm2, %v4049_v39 }
 0x465   :  { %2924 = vmatprep.mubr.bf16.mxu0 %v4187_v0 }
 0x46c   :  { %3511 = vmatmul.mubr.msk.bf16.gmra.mrb[40].mxu0 %vm2807_vm2, %v4050_v40 }
 0x46d   :  { %2934 = vmatprep.mubr.bf16.mxu0 %v4187_v0 }
 0x474   :  { %3512 = vmatmul.mubr.msk.bf16.gmra.mrb[44].mxu0 %vm2807_vm2, %v4051_v41 }
 0x475   :  { %2944 = vmatprep.mubr.bf16.mxu0 %v4187_v0 }
 0x47c   :  { %3513 = vmatmul.mubr.msk.bf16.gmra.mrb[48].mxu0 %vm2807_vm2, %v4052_v42 }
 0x47d   :  { %2954 = vmatprep.mubr.bf16.mxu0 %v4187_v0  ;;  %v2986_v0 = vrot.slane %v4413_v46, %v4365_v2 }
 0x484   :  { %3514 = vmatmul.mubr.msk.bf16.gmra.mrb[52].mxu0 %vm2807_vm2, %v4053_v43  ;;  %v3034_v43 = vrot.slane %v4413_v46, %v3033_v35 }
 0x517   :  { %v2876_v45 = vpop.f32.mrb[20].mxu0 }
 0x518   :  { %v2878_v47 = vpop.f32.mrb[21].mxu0  ;;  %v2979_v55 = vmul.f32 %v2974_v51, %v2876_v45  ;;  %v3038_v45 = vrot.slane %v4415_v48, %v3033_v35 }
 0x519   :  { %v2880_v49 = vpop.f32.mrb[22].mxu0  ;;  %v2980_v63 = vmul.f32 %v2978_v52, %v2878_v47 }
 0x51a   :  { %v2882_v50 = vpop.f32.mrb[23].mxu0  ;;  %v2981_v8 = vmul.f32 %v2974_v51, %v2880_v49  ;;  %v3049_v51 = vsub.s32 5, %v4359_v59 }
 0x51b   :  { %v2982_v12 = vmul.f32 %v2978_v52, %v2882_v50 }
 0x51f   :  { %v2886_v54 = vpop.f32.mrb[24].mxu0 }
 0x520   :  { %v2991_v56 = vmul.f32 %v2986_v0, %v2886_v54  ;;  %v2888_v57 = vpop.f32.mrb[25].mxu0 }
 0x521   :  { %v2992_v5 = vmul.f32 %v2990_v53, %v2888_v57  ;;  %v2890_v6 = vpop.f32.mrb[26].mxu0 }
 0x522   :  { %v2995_v9 = vadd.f32 %v2991_v56, %v2979_v55  ;;  %v2993_v10 = vmul.f32 %v2986_v0, %v2890_v6  ;;  %v2892_v11 = vpop.f32.mrb[27].mxu0  ;;  %v3054_v6 = vrot.slane %v4415_v48, %v3049_v51 }
 0x523   :  { %v2996_v13 = vadd.f32 %v2992_v5, %v2980_v63  ;;  %v2994_v14 = vmul.f32 %v2990_v53, %v2892_v11  ;;  %v3050_v63 = vrot.slane %v4413_v46, %v3049_v51  ;;  %v3065_v11 = vsub.s32 6, %v4359_v59 }
 0x524   :  { %v2997_v15 = vadd.f32 %v2993_v10, %v2981_v8 }
 0x525   :  { %v2998_v2 = vadd.f32 %v2994_v14, %v2982_v12  ;;  %v3070_v21 = vrot.slane %v4415_v48, %v3065_v11 }
 0x527   :  { %v2896_v18 = vpop.f32.mrb[28].mxu0 }
 0x528   :  { %v3007_v19 = vmul.f32 %v3002_v16, %v2896_v18  ;;  %v2898_v20 = vpop.f32.mrb[29].mxu0 }
 0x529   :  { %v3008_v22 = vmul.f32 %v3006_v17, %v2898_v20  ;;  %v2900_v23 = vpop.f32.mrb[30].mxu0 }
 0x52a   :  { %v3011_v24 = vadd.f32 %v3007_v19, %v2995_v9  ;;  %v3009_v7 = vmul.f32 %v3002_v16, %v2900_v23  ;;  %v2902_v25 = vpop.f32.mrb[31].mxu0  ;;  %v3066_v19 = vrot.slane %v4413_v46, %v3065_v11 }
 0x52b   :  { %v3012_v26 = vadd.f32 %v3008_v22, %v2996_v13  ;;  %v3010_v27 = vmul.f32 %v3006_v17, %v2902_v25 }
 0x52c   :  { %v3013_v28 = vadd.f32 %v3009_v7, %v2997_v15  ;;  %v3081_v7 = vsub.s32 7, %v4359_v59 }
 0x52d   :  { %v3014_v30 = vadd.f32 %v3010_v27, %v2998_v2 }
 0x52e   :  { %v3086_v35 = vrot.slane %v4415_v48, %v3081_v7 }
 0x52f   :  { %v2906_v32 = vpop.f32.mrb[32].mxu0 }
 0x530   :  { %v3023_v33 = vmul.f32 %v3018_v29, %v2906_v32  ;;  %v2908_v34 = vpop.f32.mrb[33].mxu0 }
 0x531   :  { %v3024_v36 = vmul.f32 %v3022_v31, %v2908_v34  ;;  %v2910_v4 = vpop.f32.mrb[34].mxu0 }
 0x532   :  { %v3027_v37 = vadd.f32 %v3023_v33, %v3011_v24  ;;  %v3025_v38 = vmul.f32 %v3018_v29, %v2910_v4  ;;  %v2912_v39 = vpop.f32.mrb[35].mxu0  ;;  %v3082_v33 = vrot.slane %v4413_v46, %v3081_v7 }
 0x533   :  { %v3028_v40 = vadd.f32 %v3024_v36, %v3012_v26  ;;  %v3026_v41 = vmul.f32 %v3022_v31, %v2912_v39  ;;  %v2966_v36 = vld [vmem:[#allocation10 + $0x8] sm:$0x11] }
 0x534   :  { %v3029_v42 = vadd.f32 %v3025_v38, %v3013_v28  ;;  %v2969_v39 = vunpack.c.l.bf16 %v2966_v36 }
 0x535   :  { %v3030_v44 = vadd.f32 %v3026_v41, %v3014_v30  ;;  %v2970_v41 = vunpack.c.h.bf16 %v2966_v36 }
 0x537   :  { %v2916_v47 = vpop.f32.mrb[36].mxu0  ;;  %v3102_v51 = vrot.slane %v2970_v41, %v4362_v61 }
 0x538   :  { %v3039_v49 = vmul.f32 %v3034_v43, %v2916_v47  ;;  %v2918_v50 = vpop.f32.mrb[37].mxu0 }
 0x539   :  { %v3040_v0 = vmul.f32 %v3038_v45, %v2918_v50  ;;  %v2920_v52 = vpop.f32.mrb[38].mxu0  ;;  %v3098_v50 = vrot.slane %v2969_v39, %v4362_v61  ;;  %v3118_v61 = vstv %s4471_s7 }
 0x53a   :  { %v3043_v53 = vadd.f32 %v3039_v49, %v3027_v37  ;;  %v3041_v54 = vmul.f32 %v3034_v43, %v2920_v52  ;;  %v2922_v55 = vpop.f32.mrb[39].mxu0 }
 0x53b   :  { %v3044_v56 = vadd.f32 %v3040_v0, %v3028_v40  ;;  %v3042_v57 = vmul.f32 %v3038_v45, %v2922_v55 }
 0x53c   :  { %v3045_v58 = vadd.f32 %v3041_v54, %v3029_v42 }
 0x53d   :  { %v3046_v5 = vadd.f32 %v3042_v57, %v3030_v44 }
 0x53f   :  { %v2926_v8 = vpop.f32.mrb[40].mxu0 }
 0x540   :  { %v3055_v9 = vmul.f32 %v3050_v63, %v2926_v8  ;;  %v2928_v10 = vpop.f32.mrb[41].mxu0 }
 0x541   :  { %v3056_v12 = vmul.f32 %v3054_v6, %v2928_v10  ;;  %v2930_v13 = vpop.f32.mrb[42].mxu0 }
 0x542   :  { %v3059_v14 = vadd.f32 %v3055_v9, %v3043_v53  ;;  %v3057_v15 = vmul.f32 %v3050_v63, %v2930_v13  ;;  %v2932_v16 = vpop.f32.mrb[43].mxu0 }
 0x543   :  { %v3060_v2 = vadd.f32 %v3056_v12, %v3044_v56  ;;  %v3058_v17 = vmul.f32 %v3054_v6, %v2932_v16 }
 0x544   :  { %v3061_v18 = vadd.f32 %v3057_v15, %v3045_v58 }
 0x545   :  { %v3062_v20 = vadd.f32 %v3058_v17, %v3046_v5 }
 0x547   :  { %v2936_v22 = vpop.f32.mrb[44].mxu0 }
 0x548   :  { %v3071_v23 = vmul.f32 %v3066_v19, %v2936_v22  ;;  %v2938_v24 = vpop.f32.mrb[45].mxu0 }
 0x549   :  { %v3072_v25 = vmul.f32 %v3070_v21, %v2938_v24  ;;  %v2940_v26 = vpop.f32.mrb[46].mxu0 }
 0x54a   :  { %v3075_v27 = vadd.f32 %v3071_v23, %v3059_v14  ;;  %v3073_v28 = vmul.f32 %v3066_v19, %v2940_v26  ;;  %v2942_v29 = vpop.f32.mrb[47].mxu0 }
 0x54b   :  { %v3076_v30 = vadd.f32 %v3072_v25, %v3060_v2  ;;  %v3074_v31 = vmul.f32 %v3070_v21, %v2942_v29 }
 0x54c   :  { %v3077_v32 = vadd.f32 %v3073_v28, %v3061_v18 }
 0x54d   :  { %v3078_v34 = vadd.f32 %v3074_v31, %v3062_v20 }
 0x54f   :  { %v2946_v4 = vpop.f32.mrb[48].mxu0 }
 0x550   :  { %v3087_v37 = vmul.f32 %v3082_v33, %v2946_v4  ;;  %v2948_v38 = vpop.f32.mrb[49].mxu0 }
 0x551   :  { %v3088_v40 = vmul.f32 %v3086_v35, %v2948_v38  ;;  %v2950_v59 = vpop.f32.mrb[50].mxu0 }
 0x552   :  { %v3091_v42 = vadd.f32 %v3087_v37, %v3075_v27  ;;  %v3089_v43 = vmul.f32 %v3082_v33, %v2950_v59  ;;  %v2952_v44 = vpop.f32.mrb[51].mxu0 }
 0x553   :  { %v3092_v45 = vadd.f32 %v3088_v40, %v3076_v30  ;;  %v3090_v47 = vmul.f32 %v3086_v35, %v2952_v44 }
 0x554   :  { %v3093_v49 = vadd.f32 %v3089_v43, %v3077_v32 }
 0x555   :  { %v3094_v46 = vadd.f32 %v3090_v47, %v3078_v34 }
 0x557   :  { %v2956_v48 = vpop.f32.mrb[52].mxu0 }
 0x558   :  { %v3103_v0 = vmul.f32 %v3098_v50, %v2956_v48  ;;  %v2958_v52 = vpop.f32.mrb[53].mxu0 }
 0x559   :  { %v3104_v53 = vmul.f32 %v3102_v51, %v2958_v52  ;;  %v2960_v54 = vpop.f32.mrb[54].mxu0 }
 0x55a   :  { %v3105_v55 = vmul.f32 %v3098_v50, %v2960_v54  ;;  %v2962_v56 = vpop.f32.mrb[55].mxu0  ;;  %v3107_v57 = vadd.f32 %v3103_v0, %v3091_v42 }
 0x55b   :  { %v3106_v58 = vmul.f32 %v3102_v51, %v2962_v56  ;;  %v3108_v63 = vadd.f32 %v3104_v53, %v3092_v45 }
 0x55c   :  { %v3109_v5 = vadd.f32 %v3105_v55, %v3093_v49 }
 0x55d   :  { %v3110_v6 = vadd.f32 %v3106_v58, %v3094_v46  ;;  %v3111_v8 = vadd.f32 %v3108_v63, %v3107_v57 }
 0x55f   :  { %3112 = vadd.xlane.f32.xlu0 %v3111_v8  ;;  %v3114_v9 = vadd.f32 %v3110_v6, %v3109_v5 }
 0x563   :  { %3115 = vadd.xlane.f32.xlu0 %v3114_v9 }
 0x5ec   :  { %v3113_v10 = vpop.xlane.xlu0 %3112 }
 0x5ed   :  { %v3119_v11 = vadd.f32 %v3118_v61, %v3113_v10 }
 0x5ef   :  { %v3121_v12 = vsub.f32 0.0, %v3119_v11 }
 0x5f0   :  { %v3116_v13 = vpop.xlane.xlu0 %3115 }
 0x5f1   :  { %v3123_v14 = vmul.f32 1.442695, %v3121_v12  ;;  %v3120_v15 = vadd.f32 %v3118_v61, %v3116_v13 }
 0x5f3   :  { %4054 = vpow2.f32 %v3123_v14  ;;  %v3122_v16 = vsub.f32 0.0, %v3120_v15 }
 0x5f5   :  { %v3125_v2 = vmul.f32 1.442695, %v3122_v16 }
 0x5f7   :  { %4056 = vpow2.f32 %v3125_v2 }
 0x5fd   :  { %v4055_v17 = vpop.eup %4054 }
 0x5fe   :  { %v3127_v18 = vadd.f32 1.0, %v4055_v17 }
 0x600   :  { %4058 = vrcp.f32 %v3127_v18 }
 0x601   :  { %v4057_v19 = vpop.eup %4056 }
 0x602   :  { %v3128_v20 = vadd.f32 1.0, %v4057_v19 }
 0x604   :  { %4060 = vrcp.f32 %v3128_v20 }
 0x60a   :  { %v4059_v21 = vpop.eup %4058 }
 0x60b   :  { %v3133_v22 = vmul.f32 %v4059_v21, %v4312_v60  ;;  %v3134_v23 = vmul.f32 %v4059_v21, %v4314_v62 }
 0x60d   :  { %3137 = vst [vmem:[%s4472_s8] sm:$0xff] %v3133_v22  ;;  %3138 = vst [vmem:[%s4472_s8 + $0x8] sm:$0xff] %v3134_v23 }
 0x60e   :  { %v4061_v24 = vpop.eup %4060 }
 0x60f   :  { %v3135_v7 = vmul.f32 %v4061_v24, %v4316_v1  ;;  %v3136_v25 = vmul.f32 %v4061_v24, %v4318_v3 }
 0x611   :  { %3139 = vst [vmem:[%s4472_s8 + $0x10] sm:$0xff] %v3135_v7  ;;  %3140 = vst [vmem:[%s4472_s8 + $0x18] sm:$0xff] %v3136_v25 }
 0x612   :  { %3145 = vsyncpa [#allocation4], 1 }
 0x613   :  { %3146 = vsyncpa [#allocation6], 1 }
 0x614   :  { %3147 = vsyncpa [#allocation9], 1 }

</bundles_post_ra>
